<compile_context>
chip_gen: v7x
topology: tpu7x:2x2x1
jax: 0.10.0
libtpu: 0.0.40
codegen_flags: <defaults>
</compile_context>

<pallas_src>
import functools

import jax
import jax.numpy as jnp
from jax import lax
from jax.experimental import pallas as pl
from jax.experimental.pallas import tpu as pltpu

BIG = 1.0e10
EPS = 1.0e-10
_SUBLANE = 8


def _sigmoid(x):
    # sigmoid(x) == 0.5 * tanh(x / 2) + 0.5  (exact identity); tanh is a single
    # EUP op vs exp + reciprocal for 1/(1+exp(-x)).
    return 0.5 * jnp.tanh(0.5 * x) + 0.5


def _shift_right(x, d):
    """Shift along the last (sample) axis by d lanes with zero fill."""
    rows, cols = x.shape
    if d >= cols:
        return jnp.zeros_like(x)
    return jnp.concatenate(
        [jnp.zeros((rows, d), x.dtype), x[:, :cols - d]], axis=-1)


def _vol_render_kernel(z_ref, raw_ref, norm_ref, w_ref, sc_ref):
    z = z_ref[...]                                    # [tR, S] f32
    sigma = raw_ref[3]                                # [tR, S] f32 (density)
    norm = norm_ref[...]                              # [tR, 1] f32 (||rays_d||)
    tR, S = z.shape

    # dists[j] = z[j+1] - z[j] for j < S-1, and 1e10 at the last sample.
    lane = lax.broadcasted_iota(jnp.int32, (tR, S), 1)
    z_next = jnp.concatenate([z[:, 1:], z[:, S - 1:]], axis=-1)
    dists = jnp.where(lane == S - 1, BIG, z_next - z) * norm

    # alpha = 1 - exp(-relu(sigma) * dists);  log(1 - alpha + eps) ~= -x.
    x = jnp.maximum(sigma, 0.0) * dists
    alpha = 1.0 - jnp.exp(-x)
    logt = -x

    # Exclusive prefix sum of logt along samples (exact f32 Hillis-Steele).
    # Shift first so the huge last-sample logt never enters any needed sum.
    csum = _shift_right(logt, 1)
    d = 1
    while d < S:
        csum = csum + _shift_right(csum, d)
        d *= 2
    Ts = jnp.exp(csum)                                # transmittance

    weights = alpha * Ts                              # [tR, S]
    w_ref[...] = weights

    # Per-ray reductions over the sample (lane) axis.
    c_r = jnp.sum(weights * _sigmoid(raw_ref[0]), axis=-1, keepdims=True)
    c_g = jnp.sum(weights * _sigmoid(raw_ref[1]), axis=-1, keepdims=True)
    c_b = jnp.sum(weights * _sigmoid(raw_ref[2]), axis=-1, keepdims=True)
    acc = jnp.sum(weights, axis=-1, keepdims=True)
    depth = jnp.sum(weights * z, axis=-1, keepdims=True)
    depth = jnp.where(acc <= EPS, BIG, depth)
    disp = 1.0 / jnp.maximum(EPS, depth / acc)

    # Single packed scalar store: [r, g, b, acc, depth, disp, 0, 0].
    sc_ref[...] = jnp.concatenate(
        [c_r, c_g, c_b, acc, depth, disp,
         jnp.zeros((tR, 2), dtype=sc_ref.dtype)], axis=-1)


def _round_up(v, m):
    return ((v + m - 1) // m) * m


def _pick_tile_rows(num_rays, num_samples):
    """Ray tile: big enough to amortize per-step overhead, small enough that
    double-buffered inputs/outputs plus in-kernel temporaries stay well under
    ~16 MiB (safe on v7x's 64 MiB VMEM; generous headroom on v5e/v6e)."""
    # ~16 live f32 sample-planes per row (inputs x2 buffers + temporaries).
    bytes_per_row = 4 * (num_samples * 16 + 32)
    budget = 16 * 1024 * 1024
    tile = budget // max(bytes_per_row, 1)
    tile = int(max(_SUBLANE, min(1024, (tile // _SUBLANE) * _SUBLANE)))
    # v7x has 2 TensorCores: make sure the parallel grid has >= 2 steps so
    # both cores get work (harmless on v5e/v6e).
    if num_rays > 2 * _SUBLANE:
        half = _round_up((num_rays + 1) // 2, _SUBLANE)
        tile = min(tile, half)
    tile = min(tile, _round_up(num_rays, _SUBLANE))
    return max(tile, _SUBLANE)


@functools.partial(jax.jit, static_argnames=("white_bkgd", "raw_noise_std"))
def volumetric_render(raw, z_vals, rays_d, adv_raw=None, white_bkgd=False,
                      raw_noise_std=0.0):
    """raw: [R, S, 4] (rgb + density), z_vals: [R, S], rays_d: [R, 3]."""
    if raw_noise_std is not None and raw_noise_std > 0.0:
        # TODO(synk): raw_noise_std > 0 (torch.randn noise on density) needs an
        # RNG key plumbed through; not implemented (module default 0.0 exact).
        raise NotImplementedError("raw_noise_std > 0 is not supported")

    raw = raw.astype(jnp.float32)
    z_vals = z_vals.astype(jnp.float32)
    rays_d = rays_d.astype(jnp.float32)

    R, S, C = raw.shape
    assert C == 4, "expected 3 rgb channels + 1 density channel"

    # Channel-major [4, R, S]: one contiguous lane-dense slab per channel.
    # As in the reference, rgb uses the pre-adv_raw values; only the density
    # channel sees adv_raw.
    raw_cm = jnp.transpose(raw, (2, 0, 1))
    if adv_raw is not None:
        raw_cm = raw_cm.at[3].add(adv_raw[..., 3].astype(jnp.float32))

    # ||rays_d|| precomputed once outside the kernel; [R, 1].
    norm = jnp.sqrt(jnp.sum(rays_d * rays_d, axis=-1, keepdims=True))

    t_rows = _pick_tile_rows(R, S)
    grid = (pl.cdiv(R, t_rows),)

    weights, scalars = pl.pallas_call(
        _vol_render_kernel,
        grid=grid,
        in_specs=[
            pl.BlockSpec((t_rows, S), lambda i: (i, 0)),        # z_vals
            pl.BlockSpec((4, t_rows, S), lambda i: (0, i, 0)),  # raw (chan-major)
            pl.BlockSpec((t_rows, 1), lambda i: (i, 0)),        # ||rays_d||
        ],
        out_specs=(
            pl.BlockSpec((t_rows, S), lambda i: (i, 0)),        # weights
            pl.BlockSpec((t_rows, 8), lambda i: (i, 0)),        # packed scalars
        ),
        out_shape=(
            jax.ShapeDtypeStruct((R, S), jnp.float32),
            jax.ShapeDtypeStruct((R, 8), jnp.float32),
        ),
        compiler_params=pltpu.CompilerParams(
            dimension_semantics=("parallel",),
            vmem_limit_bytes=40 * 1024 * 1024,
        ),
    )(z_vals, raw_cm, norm)

    rgb_map = scalars[:, 0:3]
    acc = scalars[:, 3:4]
    depth = scalars[:, 4:5]
    disp = scalars[:, 5:6]
    if white_bkgd:
        rgb_map = rgb_map + (1.0 - acc)

    return dict(rgb=rgb_map, disp=disp, acc=acc, weights=weights, depth=depth)


def _reference(raw, z_vals, rays_d, adv_raw=None, white_bkgd=False):
    """Plain-JAX transcription of the PyTorch forward, for verification."""
    dists = z_vals[..., 1:] - z_vals[..., :-1]
    dists = jnp.concatenate([dists, BIG * jnp.ones_like(dists[..., :1])], -1)
    dists = dists * jnp.linalg.norm(rays_d[..., None, :], axis=-1)
    rgb = 1.0 / (1.0 + jnp.exp(-raw[..., :-1]))
    if adv_raw is not None:
        raw = raw + adv_raw
    alpha = raw[..., -1]
    alpha = 1.0 - jnp.exp(-jnp.maximum(alpha, 0.0) * dists)
    Ts = jnp.concatenate([jnp.ones_like(alpha[..., :1]), 1.0 - alpha + EPS], -1)
    Ts = jnp.cumprod(Ts, -1)[..., :-1]
    weights = alpha * Ts
    rgb_map = jnp.sum(weights[..., None] * rgb, -2)
    depth_map = jnp.sum(weights * z_vals, -1, keepdims=True)
    acc_map = jnp.sum(weights, -1, keepdims=True)
    depth_map = jnp.where(acc_map <= EPS, BIG, depth_map)
    disp_map = 1.0 / jnp.maximum(jnp.full_like(depth_map, EPS),
                                 depth_map / acc_map)
    if white_bkgd:
        rgb_map = rgb_map + (1.0 - acc_map)
    return dict(rgb=rgb_map, disp=disp_map, acc=acc_map,
                weights=weights, depth=depth_map)


if __name__ == "__main__":
    key = jax.random.PRNGKey(0)
    k1, k2, k3 = jax.random.split(key, 3)

    num_rays, num_samples, channels = 203, 64, 4
    raw = jax.random.normal(k1, (num_rays, num_samples, channels),
                            dtype=jnp.float32)
    base = jnp.linspace(2.0, 6.0, num_samples, dtype=jnp.float32)
    z_vals = base[None, :] + 0.05 * jax.random.uniform(
        k2, (num_rays, num_samples), dtype=jnp.float32)
    rays_d = jax.random.normal(k3, (num_rays, 3), dtype=jnp.float32)

    out = volumetric_render(raw, z_vals, rays_d)
    jax.block_until_ready(out)

    ref = _reference(raw, z_vals, rays_d)
    for name in ("rgb", "disp", "acc", "weights", "depth"):
        assert out[name].shape == ref[name].shape, name
        assert jnp.allclose(out[name], ref[name], atol=2e-3, rtol=2e-3), name

    print("KERNEL_OK")
</pallas_src>

<mosaic_0001>
module attributes {stable_mosaic.version = 11 : i64} {
  func.func @_vol_render_kernel(%arg0: i32, %arg1: memref<104x64xf32, #tpu.memory_space<vmem>>, %arg2: memref<4x104x64xf32, #tpu.memory_space<vmem>>, %arg3: memref<104x1xf32, #tpu.memory_space<vmem>>, %arg4: memref<104x64xf32, #tpu.memory_space<vmem>>, %arg5: memref<104x8xf32, #tpu.memory_space<vmem>>) attributes {dimension_semantics = [#tpu.dimension_semantics<parallel>], iteration_bounds = array<i64: 2>, scalar_prefetch = 0 : i64, scratch_operands = 0 : i64, tpu.core_type = #tpu.core_type<tc>, window_params = [{transform_indices = @transform_0, window_bounds = array<i64: 104, 64>}, {transform_indices = @transform_1, window_bounds = array<i64: 4, 104, 64>}, {transform_indices = @transform_2, window_bounds = array<i64: 104, 1>}, {transform_indices = @transform_3, window_bounds = array<i64: 104, 64>}, {transform_indices = @transform_4, window_bounds = array<i64: 104, 8>}]} {
    %c0 = arith.constant 0 : index
    %c0_0 = arith.constant 0 : index
    %0 = vector.load %arg1[%c0, %c0_0] : memref<104x64xf32, #tpu.memory_space<vmem>>, vector<104x64xf32>
    %c3 = arith.constant 3 : index
    %c0_1 = arith.constant 0 : index
    %c0_2 = arith.constant 0 : index
    %1 = vector.load %arg2[%c3, %c0_1, %c0_2] : memref<4x104x64xf32, #tpu.memory_space<vmem>>, vector<1x104x64xf32>
    %2 = vector.shape_cast %1 : vector<1x104x64xf32> to vector<104x64xf32>
    %c0_3 = arith.constant 0 : index
    %c0_4 = arith.constant 0 : index
    %3 = vector.load %arg3[%c0_3, %c0_4] : memref<104x1xf32, #tpu.memory_space<vmem>>, vector<104x1xf32>
    %4 = tpu.iota {dimensions = array<i32: 1>} : vector<104x64xi32>
    %5 = vector.extract_strided_slice %0 {offsets = [0, 1], sizes = [104, 63], strides = [1, 1]} : vector<104x64xf32> to vector<104x63xf32>
    %6 = vector.extract_strided_slice %0 {offsets = [0, 63], sizes = [104, 1], strides = [1, 1]} : vector<104x64xf32> to vector<104x1xf32>
    %7 = tpu.concatenate %5, %6 in 1 : vector<104x63xf32>, vector<104x1xf32> -> vector<104x64xf32>
    %c63_i32 = arith.constant 63 : i32
    %8 = vector.broadcast %c63_i32 : i32 to vector<104x64xi32>
    %9 = arith.cmpi eq, %4, %8 : vector<104x64xi32>
    %10 = arith.subf %7, %0 : vector<104x64xf32>
    %cst = arith.constant 1.000000e+10 : f32
    %11 = vector.broadcast %cst : f32 to vector<104x64xf32>
    %12 = arith.select %9, %11, %10 : vector<104x64xi1>, vector<104x64xf32>
    %13 = vector.broadcast %3 : vector<104x1xf32> to vector<104x64xf32>
    %14 = arith.mulf %12, %13 : vector<104x64xf32>
    %cst_5 = arith.constant 0.000000e+00 : f32
    %15 = vector.broadcast %cst_5 : f32 to vector<104x64xf32>
    %16 = arith.maximumf %2, %15 : vector<104x64xf32>
    %17 = arith.mulf %16, %14 : vector<104x64xf32>
    %cst_6 = arith.constant 0.000000e+00 : f32
    %18 = vector.broadcast %cst_6 : f32 to vector<104x64xf32>
    %19 = arith.subf %18, %17 : vector<104x64xf32>
    %20 = math.exp %19 : vector<104x64xf32>
    %cst_7 = arith.constant 1.000000e+00 : f32
    %21 = vector.broadcast %cst_7 : f32 to vector<104x64xf32>
    %22 = arith.subf %21, %20 : vector<104x64xf32>
    %cst_8 = arith.constant 0.000000e+00 : f32
    %23 = vector.broadcast %cst_8 : f32 to vector<104x64xf32>
    %24 = arith.subf %23, %17 : vector<104x64xf32>
    %cst_9 = arith.constant 0.000000e+00 : f32
    %25 = vector.broadcast %cst_9 : f32 to vector<104x1xf32>
    %26 = vector.extract_strided_slice %24 {offsets = [0, 0], sizes = [104, 63], strides = [1, 1]} : vector<104x64xf32> to vector<104x63xf32>
    %27 = tpu.concatenate %25, %26 in 1 : vector<104x1xf32>, vector<104x63xf32> -> vector<104x64xf32>
    %cst_10 = arith.constant 0.000000e+00 : f32
    %28 = vector.broadcast %cst_10 : f32 to vector<104x1xf32>
    %29 = vector.extract_strided_slice %27 {offsets = [0, 0], sizes = [104, 63], strides = [1, 1]} : vector<104x64xf32> to vector<104x63xf32>
    %30 = tpu.concatenate %28, %29 in 1 : vector<104x1xf32>, vector<104x63xf32> -> vector<104x64xf32>
    %31 = arith.addf %27, %30 : vector<104x64xf32>
    %cst_11 = arith.constant 0.000000e+00 : f32
    %32 = vector.broadcast %cst_11 : f32 to vector<104x2xf32>
    %33 = vector.extract_strided_slice %31 {offsets = [0, 0], sizes = [104, 62], strides = [1, 1]} : vector<104x64xf32> to vector<104x62xf32>
    %34 = tpu.concatenate %32, %33 in 1 : vector<104x2xf32>, vector<104x62xf32> -> vector<104x64xf32>
    %35 = arith.addf %31, %34 : vector<104x64xf32>
    %cst_12 = arith.constant 0.000000e+00 : f32
    %36 = vector.broadcast %cst_12 : f32 to vector<104x4xf32>
    %37 = vector.extract_strided_slice %35 {offsets = [0, 0], sizes = [104, 60], strides = [1, 1]} : vector<104x64xf32> to vector<104x60xf32>
    %38 = tpu.concatenate %36, %37 in 1 : vector<104x4xf32>, vector<104x60xf32> -> vector<104x64xf32>
    %39 = arith.addf %35, %38 : vector<104x64xf32>
    %cst_13 = arith.constant 0.000000e+00 : f32
    %40 = vector.broadcast %cst_13 : f32 to vector<104x8xf32>
    %41 = vector.extract_strided_slice %39 {offsets = [0, 0], sizes = [104, 56], strides = [1, 1]} : vector<104x64xf32> to vector<104x56xf32>
    %42 = tpu.concatenate %40, %41 in 1 : vector<104x8xf32>, vector<104x56xf32> -> vector<104x64xf32>
    %43 = arith.addf %39, %42 : vector<104x64xf32>
    %cst_14 = arith.constant 0.000000e+00 : f32
    %44 = vector.broadcast %cst_14 : f32 to vector<104x16xf32>
    %45 = vector.extract_strided_slice %43 {offsets = [0, 0], sizes = [104, 48], strides = [1, 1]} : vector<104x64xf32> to vector<104x48xf32>
    %46 = tpu.concatenate %44, %45 in 1 : vector<104x16xf32>, vector<104x48xf32> -> vector<104x64xf32>
    %47 = arith.addf %43, %46 : vector<104x64xf32>
    %cst_15 = arith.constant 0.000000e+00 : f32
    %48 = vector.broadcast %cst_15 : f32 to vector<104x32xf32>
    %49 = vector.extract_strided_slice %47 {offsets = [0, 0], sizes = [104, 32], strides = [1, 1]} : vector<104x64xf32> to vector<104x32xf32>
    %50 = tpu.concatenate %48, %49 in 1 : vector<104x32xf32>, vector<104x32xf32> -> vector<104x64xf32>
    %51 = arith.addf %47, %50 : vector<104x64xf32>
    %52 = math.exp %51 : vector<104x64xf32>
    %53 = arith.mulf %22, %52 : vector<104x64xf32>
    %c0_16 = arith.constant 0 : index
    %c0_17 = arith.constant 0 : index
    %54 = vector.load %arg4[%c0_16, %c0_17] : memref<104x64xf32, #tpu.memory_space<vmem>>, vector<104x64xf32>
    tpu.vector_store %arg4[%c0_16, %c0_17], %53 {strides = array<i32>} : memref<104x64xf32, #tpu.memory_space<vmem>>, vector<104x64xf32>,
    %c0_18 = arith.constant 0 : index
    %c0_19 = arith.constant 0 : index
    %c0_20 = arith.constant 0 : index
    %55 = vector.load %arg2[%c0_18, %c0_19, %c0_20] : memref<4x104x64xf32, #tpu.memory_space<vmem>>, vector<1x104x64xf32>
    %56 = vector.shape_cast %55 : vector<1x104x64xf32> to vector<104x64xf32>
    %cst_21 = arith.constant 5.000000e-01 : f32
    %57 = vector.broadcast %cst_21 : f32 to vector<104x64xf32>
    %58 = arith.mulf %57, %56 : vector<104x64xf32>
    %59 = math.tanh %58 : vector<104x64xf32>
    %cst_22 = arith.constant 5.000000e-01 : f32
    %60 = vector.broadcast %cst_22 : f32 to vector<104x64xf32>
    %61 = arith.mulf %60, %59 : vector<104x64xf32>
    %cst_23 = arith.constant 5.000000e-01 : f32
    %62 = vector.broadcast %cst_23 : f32 to vector<104x64xf32>
    %63 = arith.addf %61, %62 : vector<104x64xf32>
    %64 = arith.mulf %53, %63 : vector<104x64xf32>
    %cst_24 = arith.constant dense<0.000000e+00> : vector<104xf32>
    %65 = vector.multi_reduction <add>, %64, %cst_24 [1] : vector<104x64xf32> to vector<104xf32>
    %66 = vector.shape_cast %65 : vector<104xf32> to vector<104x1xf32>
    %c1 = arith.constant 1 : index
    %c0_25 = arith.constant 0 : index
    %c0_26 = arith.constant 0 : index
    %67 = vector.load %arg2[%c1, %c0_25, %c0_26] : memref<4x104x64xf32, #tpu.memory_space<vmem>>, vector<1x104x64xf32>
    %68 = vector.shape_cast %67 : vector<1x104x64xf32> to vector<104x64xf32>
    %cst_27 = arith.constant 5.000000e-01 : f32
    %69 = vector.broadcast %cst_27 : f32 to vector<104x64xf32>
    %70 = arith.mulf %69, %68 : vector<104x64xf32>
    %71 = math.tanh %70 : vector<104x64xf32>
    %cst_28 = arith.constant 5.000000e-01 : f32
    %72 = vector.broadcast %cst_28 : f32 to vector<104x64xf32>
    %73 = arith.mulf %72, %71 : vector<104x64xf32>
    %cst_29 = arith.constant 5.000000e-01 : f32
    %74 = vector.broadcast %cst_29 : f32 to vector<104x64xf32>
    %75 = arith.addf %73, %74 : vector<104x64xf32>
    %76 = arith.mulf %53, %75 : vector<104x64xf32>
    %cst_30 = arith.constant dense<0.000000e+00> : vector<104xf32>
    %77 = vector.multi_reduction <add>, %76, %cst_30 [1] : vector<104x64xf32> to vector<104xf32>
    %78 = vector.shape_cast %77 : vector<104xf32> to vector<104x1xf32>
    %c2 = arith.constant 2 : index
    %c0_31 = arith.constant 0 : index
    %c0_32 = arith.constant 0 : index
    %79 = vector.load %arg2[%c2, %c0_31, %c0_32] : memref<4x104x64xf32, #tpu.memory_space<vmem>>, vector<1x104x64xf32>
    %80 = vector.shape_cast %79 : vector<1x104x64xf32> to vector<104x64xf32>
    %cst_33 = arith.constant 5.000000e-01 : f32
    %81 = vector.broadcast %cst_33 : f32 to vector<104x64xf32>
    %82 = arith.mulf %81, %80 : vector<104x64xf32>
    %83 = math.tanh %82 : vector<104x64xf32>
    %cst_34 = arith.constant 5.000000e-01 : f32
    %84 = vector.broadcast %cst_34 : f32 to vector<104x64xf32>
    %85 = arith.mulf %84, %83 : vector<104x64xf32>
    %cst_35 = arith.constant 5.000000e-01 : f32
    %86 = vector.broadcast %cst_35 : f32 to vector<104x64xf32>
    %87 = arith.addf %85, %86 : vector<104x64xf32>
    %88 = arith.mulf %53, %87 : vector<104x64xf32>
    %cst_36 = arith.constant dense<0.000000e+00> : vector<104xf32>
    %89 = vector.multi_reduction <add>, %88, %cst_36 [1] : vector<104x64xf32> to vector<104xf32>
    %90 = vector.shape_cast %89 : vector<104xf32> to vector<104x1xf32>
    %cst_37 = arith.constant dense<0.000000e+00> : vector<104xf32>
    %91 = vector.multi_reduction <add>, %53, %cst_37 [1] : vector<104x64xf32> to vector<104xf32>
    %92 = vector.shape_cast %91 : vector<104xf32> to vector<104x1xf32>
    %93 = arith.mulf %53, %0 : vector<104x64xf32>
    %cst_38 = arith.constant dense<0.000000e+00> : vector<104xf32>
    %94 = vector.multi_reduction <add>, %93, %cst_38 [1] : vector<104x64xf32> to vector<104xf32>
    %95 = vector.shape_cast %94 : vector<104xf32> to vector<104x1xf32>
    %cst_39 = arith.constant 1.000000e-10 : f32
    %96 = vector.broadcast %cst_39 : f32 to vector<104x1xf32>
    %97 = arith.cmpf ole, %92, %96 : vector<104x1xf32>
    %cst_40 = arith.constant 1.000000e+10 : f32
    %98 = vector.broadcast %cst_40 : f32 to vector<104x1xf32>
    %99 = arith.select %97, %98, %95 : vector<104x1xi1>, vector<104x1xf32>
    %100 = arith.divf %99, %92 : vector<104x1xf32>
    %cst_41 = arith.constant 1.000000e-10 : f32
    %101 = vector.broadcast %cst_41 : f32 to vector<104x1xf32>
    %102 = arith.maximumf %101, %100 : vector<104x1xf32>
    %cst_42 = arith.constant 1.000000e+00 : f32
    %103 = vector.broadcast %cst_42 : f32 to vector<104x1xf32>
    %104 = arith.divf %103, %102 : vector<104x1xf32>
    %cst_43 = arith.constant 0.000000e+00 : f32
    %105 = vector.broadcast %cst_43 : f32 to vector<104x2xf32>
    %106 = tpu.concatenate %66, %78, %90, %92, %99, %104, %105 in 1 : vector<104x1xf32>, vector<104x1xf32>, vector<104x1xf32>, vector<104x1xf32>, vector<104x1xf32>, vector<104x1xf32>, vector<104x2xf32> -> vector<104x8xf32>
    %c0_44 = arith.constant 0 : index
    %c0_45 = arith.constant 0 : index
    %107 = vector.load %arg5[%c0_44, %c0_45] : memref<104x8xf32, #tpu.memory_space<vmem>>, vector<104x8xf32>
    tpu.vector_store %arg5[%c0_44, %c0_45], %106 {strides = array<i32>} : memref<104x8xf32, #tpu.memory_space<vmem>>, vector<104x8xf32>,
    return
  }
  func.func @transform_0(%arg0: i32) -> (i32, i32) {
    %c0_i32 = arith.constant 0 : i32
    %c0_i32_0 = arith.constant 0 : i32
    return %arg0, %c0_i32 : i32, i32
  }
  func.func @transform_1(%arg0: i32) -> (i32, i32, i32) {
    %c0_i32 = arith.constant 0 : i32
    %c0_i32_0 = arith.constant 0 : i32
    %c0_i32_1 = arith.constant 0 : i32
    return %c0_i32, %arg0, %c0_i32_0 : i32, i32, i32
  }
  func.func @transform_2(%arg0: i32) -> (i32, i32) {
    %c0_i32 = arith.constant 0 : i32
    %c0_i32_0 = arith.constant 0 : i32
    return %arg0, %c0_i32 : i32, i32
  }
  func.func @transform_3(%arg0: i32) -> (i32, i32) {
    %c0_i32 = arith.constant 0 : i32
    %c0_i32_0 = arith.constant 0 : i32
    return %arg0, %c0_i32 : i32, i32
  }
  func.func @transform_4(%arg0: i32) -> (i32, i32) {
    %c0_i32 = arith.constant 0 : i32
    %c0_i32_0 = arith.constant 0 : i32
    return %arg0, %c0_i32 : i32, i32
  }
}

</mosaic_0001>

<bundles_post_ra>
// kernel: volumetric_render.1
= control target key start
LH: loop header
LB: loop body
LE: loop exit
PB: predicated region body
PF: predicated region fallthrough
CT: control target
= control target key end

     0   :  { %s2469_s15 = smov 0   ;;  %s2471_s16 = smov 0   ;;  %s3987_s0 = inlined_call_operand.vmem [shape: f32[203,64], index: 0, kind: input, shape index: {}]   ;;  %s3988_s1 = inlined_call_operand.vmem [shape: f32[4,203,64], index: 1, kind: input, shape index: {}]   ;;  %s3989_s2 = inlined_call_operand.vmem [shape: f32[203,1], index: 2, kind: input, shape index: {}]   ;;  %s3990_s3 = inlined_call_operand.vmem [shape: f32[203,64], index: 3, kind: output, shape index: {0}]   ;;  %s3991_s4 = inlined_call_operand.vmem [shape: f32[203,8], index: 4, kind: output, shape index: {1}]  }
   0x1   :  { %s2473_s17 = smov 0  }
   0x2 LB: > { %s2129_s18 = sadd.s32 4294967295, %s2434_s17   ;;  %s2486_s19 = sadd.s32 1, %s2434_s17   ;;  %s2434_s17 = sphi %s2473_s17, %s4025_s17   ;;  %s2430_s16 = sphi %s2471_s16, %s4024_s16   ;;  %s2426_s15 = sphi %s2469_s15, %s4023_s15  }
   0x3   : > { %s45_s20 = ssub.s32 %s2434_s17, %s2486_s19  ;;  %s48_s21 = sadd.s32 1, %s2430_s16 }
   0x4   : > { %p46_p0 = scmp.eq.s32.totalorder %s45_s20, 0  ;;  %p55_p1 = scmp.ne.s32.totalorder %s2430_s16, %s2426_s15 }
   0x5   : > { %p56_p2 = scmp.eq.s32.totalorder %s2434_s17, 0  ;;  %p2132_p4 = scmp.ge.s32.totalorder %s2434_s17, 2 }
   0x6   : > { %s2495_s22 = scalar_select %p46_p0, %s2430_s16, %s48_s21  }
   0x7   : > { %p57_p3 = por %p56_p2, %p55_p1  ;;  %159 = sbr.rel (%p2132_p4) target bundleno = 45 (0x2d), region = 16 }
   0xe   : > { %171 = sbr.rel (!%p57_p3) target bundleno = 45 (0x2d), region = 24  ;;  %s173_s23 = sand.u32 (%p57_p3), 1, %s2430_s16  }
   0xf   : > { %s2180_s24 = smul.u32 (%p57_p3), 104, %s2434_s17 }
  0x10   : > { %s2181_s25 = smul.u32 (%p57_p3), 416, %s173_s23 }
  0x11   : > { %s2503_s28 = scalar_lea.vmem (%p57_p3), %s3988_s1, %s2180_s24 }
  0x12   : > { %v308_v0 = vld [vmem:[%s2503_s28] sm:$0xff] (%p57_p3)  ;;  %v310_v1 = vld [vmem:[%s2503_s28 + $0x8] sm:$0xff] (%p57_p3)  ;;  %v312_v2 = vld [vmem:[%s2503_s28 + $0x10] sm:$0xff] (%p57_p3)  ;;  %s2508_s29 = scalar_lea.vmem (%p57_p3), [#allocation2], %s2181_s25 }
  0x13   : > { %309 = vst [vmem:[%s2508_s29] sm:$0xff] (%p57_p3), %v308_v0  ;;  %311 = vst [vmem:[%s2508_s29 + $0x8] sm:$0xff] (%p57_p3), %v310_v1  ;;  %v314_v3 = vld [vmem:[%s2503_s28 + $0x18] sm:$0xff] (%p57_p3)  ;;  %v316_v4 = vld [vmem:[%s2503_s28 + $0x20] sm:$0xff] (%p57_p3) }
  0x14   : > { %313 = vst [vmem:[%s2508_s29 + $0x10] sm:$0xff] (%p57_p3), %v312_v2  ;;  %v318_v5 = vld [vmem:[%s2503_s28 + $0x28] sm:$0xff] (%p57_p3)  ;;  %315 = vst [vmem:[%s2508_s29 + $0x18] sm:$0xff] (%p57_p3), %v314_v3  ;;  %v320_v6 = vld [vmem:[%s2503_s28 + $0x30] sm:$0xff] (%p57_p3) }
  0x15   : > { %317 = vst [vmem:[%s2508_s29 + $0x20] sm:$0xff] %v316_v4  ;;  %319 = vst [vmem:[%s2508_s29 + $0x28] sm:$0xff] %v318_v5  ;;  %v322_v7 = vld [vmem:[%s2503_s28 + $0x38] sm:$0xff]  ;;  %v324_v8 = vld [vmem:[%s2503_s28 + $0x40] sm:$0xff] }
  0x16   : > { %321 = vst [vmem:[%s2508_s29 + $0x30] sm:$0xff] %v320_v6  ;;  %323 = vst [vmem:[%s2508_s29 + $0x38] sm:$0xff] %v322_v7  ;;  %v326_v9 = vld [vmem:[%s2503_s28 + $0x48] sm:$0xff]  ;;  %v328_v10 = vld [vmem:[%s2503_s28 + $0x50] sm:$0xff] }
  0x17   : > { %325 = vst [vmem:[%s2508_s29 + $0x40] sm:$0xff] %v324_v8  ;;  %v330_v11 = vld [vmem:[%s2503_s28 + $0x58] sm:$0xff]  ;;  %327 = vst [vmem:[%s2508_s29 + $0x48] sm:$0xff] %v326_v9  ;;  %v332_v12 = vld [vmem:[%s2503_s28 + $0x60] sm:$0xff] }
  0x18   : > { %329 = vst [vmem:[%s2508_s29 + $0x50] sm:$0xff] %v328_v10  ;;  %331 = vst [vmem:[%s2508_s29 + $0x58] sm:$0xff] %v330_v11  ;;  %v334_v13 = vld [vmem:[%s2503_s28 + $0xd0] sm:$0xff]  ;;  %v336_v14 = vld [vmem:[%s2503_s28 + $0xd8] sm:$0xff] }
  0x19   : > { %333 = vst [vmem:[%s2508_s29 + $0x60] sm:$0xff] %v332_v12  ;;  %335 = vst [vmem:[%s2508_s29 + $0x68] sm:$0xff] %v334_v13  ;;  %v338_v15 = vld [vmem:[%s2503_s28 + $0xe0] sm:$0xff]  ;;  %v340_v16 = vld [vmem:[%s2503_s28 + $0xe8] sm:$0xff] }
  0x1a   : > { %337 = vst [vmem:[%s2508_s29 + $0x70] sm:$0xff] %v336_v14  ;;  %v342_v17 = vld [vmem:[%s2503_s28 + $0xf0] sm:$0xff]  ;;  %339 = vst [vmem:[%s2508_s29 + $0x78] sm:$0xff] %v338_v15  ;;  %v344_v18 = vld [vmem:[%s2503_s28 + $0xf8] sm:$0xff] }
  0x1b   : > { %341 = vst [vmem:[%s2508_s29 + $0x80] sm:$0xff] %v340_v16  ;;  %343 = vst [vmem:[%s2508_s29 + $0x88] sm:$0xff] %v342_v17  ;;  %v346_v19 = vld [vmem:[%s2503_s28 + $0x100] sm:$0xff]  ;;  %v348_v20 = vld [vmem:[%s2503_s28 + $0x108] sm:$0xff] }
  0x1c   : > { %345 = vst [vmem:[%s2508_s29 + $0x90] sm:$0xff] %v344_v18  ;;  %347 = vst [vmem:[%s2508_s29 + $0x98] sm:$0xff] %v346_v19  ;;  %v350_v21 = vld [vmem:[%s2503_s28 + $0x110] sm:$0xff]  ;;  %v352_v22 = vld [vmem:[%s2503_s28 + $0x118] sm:$0xff] }
  0x1d   : > { %349 = vst [vmem:[%s2508_s29 + $0xa0] sm:$0xff] %v348_v20  ;;  %v354_v23 = vld [vmem:[%s2503_s28 + $0x120] sm:$0xff]  ;;  %351 = vst [vmem:[%s2508_s29 + $0xa8] sm:$0xff] %v350_v21  ;;  %v356_v24 = vld [vmem:[%s2503_s28 + $0x128] sm:$0xff] }
  0x1e   : > { %353 = vst [vmem:[%s2508_s29 + $0xb0] sm:$0xff] %v352_v22  ;;  %355 = vst [vmem:[%s2508_s29 + $0xb8] sm:$0xff] %v354_v23  ;;  %v358_v25 = vld [vmem:[%s2503_s28 + $0x130] sm:$0xff]  ;;  %v360_v26 = vld [vmem:[%s2503_s28 + $0x1a0] sm:$0xff] }
  0x1f   : > { %357 = vst [vmem:[%s2508_s29 + $0xc0] sm:$0xff] %v356_v24  ;;  %359 = vst [vmem:[%s2508_s29 + $0xc8] sm:$0xff] %v358_v25  ;;  %v362_v27 = vld [vmem:[%s2503_s28 + $0x1a8] sm:$0xff]  ;;  %v364_v28 = vld [vmem:[%s2503_s28 + $0x1b0] sm:$0xff] }
  0x20   : > { %361 = vst [vmem:[%s2508_s29 + $0xd0] sm:$0xff] %v360_v26  ;;  %v366_v29 = vld [vmem:[%s2503_s28 + $0x1b8] sm:$0xff]  ;;  %363 = vst [vmem:[%s2508_s29 + $0xd8] sm:$0xff] %v362_v27  ;;  %v368_v30 = vld [vmem:[%s2503_s28 + $0x1c0] sm:$0xff] }
  0x21   : > { %365 = vst [vmem:[%s2508_s29 + $0xe0] sm:$0xff] %v364_v28  ;;  %367 = vst [vmem:[%s2508_s29 + $0xe8] sm:$0xff] %v366_v29  ;;  %v370_v31 = vld [vmem:[%s2503_s28 + $0x1c8] sm:$0xff]  ;;  %v372_v32 = vld [vmem:[%s2503_s28 + $0x1d0] sm:$0xff] }
  0x22   : > { %369 = vst [vmem:[%s2508_s29 + $0xf0] sm:$0xff] %v368_v30  ;;  %371 = vst [vmem:[%s2508_s29 + $0xf8] sm:$0xff] %v370_v31  ;;  %v374_v33 = vld [vmem:[%s2503_s28 + $0x1d8] sm:$0xff]  ;;  %v376_v34 = vld [vmem:[%s2503_s28 + $0x1e0] sm:$0xff] }
  0x23   : > { %373 = vst [vmem:[%s2508_s29 + $0x100] sm:$0xff] %v372_v32  ;;  %v378_v35 = vld [vmem:[%s2503_s28 + $0x1e8] sm:$0xff]  ;;  %375 = vst [vmem:[%s2508_s29 + $0x108] sm:$0xff] %v374_v33  ;;  %v380_v36 = vld [vmem:[%s2503_s28 + $0x1f0] sm:$0xff] }
  0x24   : > { %377 = vst [vmem:[%s2508_s29 + $0x110] sm:$0xff] %v376_v34  ;;  %379 = vst [vmem:[%s2508_s29 + $0x118] sm:$0xff] %v378_v35  ;;  %v382_v37 = vld [vmem:[%s2503_s28 + $0x1f8] sm:$0xff]  ;;  %v384_v38 = vld [vmem:[%s2503_s28 + $0x200] sm:$0xff] }
  0x25   : > { %381 = vst [vmem:[%s2508_s29 + $0x120] sm:$0xff] %v380_v36  ;;  %383 = vst [vmem:[%s2508_s29 + $0x128] sm:$0xff] %v382_v37  ;;  %v386_v39 = vld [vmem:[%s2503_s28 + $0x270] sm:$0xff]  ;;  %v388_v40 = vld [vmem:[%s2503_s28 + $0x278] sm:$0xff] }
  0x26   : > { %385 = vst [vmem:[%s2508_s29 + $0x130] sm:$0xff] %v384_v38  ;;  %v390_v41 = vld [vmem:[%s2503_s28 + $0x280] sm:$0xff]  ;;  %387 = vst [vmem:[%s2508_s29 + $0x138] sm:$0xff] %v386_v39  ;;  %v392_v42 = vld [vmem:[%s2503_s28 + $0x288] sm:$0xff] }
  0x27   : > { %389 = vst [vmem:[%s2508_s29 + $0x140] sm:$0xff] %v388_v40  ;;  %391 = vst [vmem:[%s2508_s29 + $0x148] sm:$0xff] %v390_v41  ;;  %v394_v43 = vld [vmem:[%s2503_s28 + $0x290] sm:$0xff]  ;;  %v396_v44 = vld [vmem:[%s2503_s28 + $0x298] sm:$0xff] }
  0x28   : > { %393 = vst [vmem:[%s2508_s29 + $0x150] sm:$0xff] %v392_v42  ;;  %395 = vst [vmem:[%s2508_s29 + $0x158] sm:$0xff] %v394_v43  ;;  %v398_v45 = vld [vmem:[%s2503_s28 + $0x2a0] sm:$0xff]  ;;  %v400_v46 = vld [vmem:[%s2503_s28 + $0x2a8] sm:$0xff] }
  0x29   : > { %397 = vst [vmem:[%s2508_s29 + $0x160] sm:$0xff] %v396_v44  ;;  %v402_v47 = vld [vmem:[%s2503_s28 + $0x2b0] sm:$0xff]  ;;  %399 = vst [vmem:[%s2508_s29 + $0x168] sm:$0xff] %v398_v45  ;;  %v404_v48 = vld [vmem:[%s2503_s28 + $0x2b8] sm:$0xff] }
  0x2a   : > { %401 = vst [vmem:[%s2508_s29 + $0x170] sm:$0xff] %v400_v46  ;;  %403 = vst [vmem:[%s2508_s29 + $0x178] sm:$0xff] %v402_v47  ;;  %v406_v49 = vld [vmem:[%s2503_s28 + $0x2c0] sm:$0xff]  ;;  %v408_v50 = vld [vmem:[%s2503_s28 + $0x2c8] sm:$0xff] }
  0x2b   : > { %405 = vst [vmem:[%s2508_s29 + $0x180] sm:$0xff] %v404_v48  ;;  %407 = vst [vmem:[%s2508_s29 + $0x188] sm:$0xff] %v406_v49  ;;  %v410_v51 = vld [vmem:[%s2503_s28 + $0x2d0] sm:$0xff] }
  0x2c   : > { %409 = vst [vmem:[%s2508_s29 + $0x190] sm:$0xff] %v408_v50  ;;  %411 = vst [vmem:[%s2508_s29 + $0x198] sm:$0xff] %v410_v51 }
  0x2d PF: > { %p2134_p5 = scmp.ge.s32.totalorder %s2434_s17, 1  ;;  %p425_p6 = scmp.lt.s32.totalorder %s2434_s17, 3 }
  0x2f   : > { %p426_p7 = pnand %p2134_p5, %p425_p6 }
  0x31   : > { %429 = sbr.rel (%p426_p7) target bundleno = 1348 (0x544), region = 66 }
  0x38   : > { %s472_s30 = smul.u32 13, %s2129_s18  ;;  %v2436_v52 = vmov 0   ;;  %s2437_s12 = smov 127   ;;  %v537_v25 = vlaneseq  ;;  %vm591_vm0 = vcmask 515072   ;;  %vm840_vm2 = vcmask 7168  }
  0x39   : > { %2216 = vset.pattern.permute.xlu1 %v2436_v52  ;;  %2215 = vset.pattern.permute.xlu0 %v2436_v52  ;;  %s432_s13 = sand.u32 1, %s2426_s15   ;;  %s2438_s15 = smov 1   ;;  %vm984_vm3 = vcmask 15360   ;;  %vm1063_vm4 = vcmask 31744   ;;  %vm1142_vm5 = vcmask 64512   ;;  %vm1221_vm6 = vcmask 130048  }
  0x3a   : > { %p473_p8 = scmp.lt.s32.totalorder %s472_s30, 25  ;;  %s2182_s14 = smul.u32 416, %s432_s13  ;;  %v2691_v28 = vand.u32 127, %v537_v25  ;;  %vm1300_vm7 = vcmask 261120   ;;  %vm1366_vm8 = vcmask 523264  }
  0x3b   : > { %s2439_s18 = smov 2   ;;  %s2440_s20 = smov 4  }
  0x3c   : > { %s4027_s30 = smov (!%p473_p8, %s472_s30), 25  ;;  %s2695_s17 = scalar_lea.vmem [#allocation2], %s2182_s14  ;;  %vm605_vm1 = vcmp.eq.s32.totalorder %v2691_v28, 63 }
  0x3d   : > { %s2615_s5 = sshll.u32 %s4027_s30, 3  ;;  %v2139_v31 = vld [vmem:[%s2695_s17 + $0x138] sm:$0xff]  ;;  %v2140_v38 = vld [vmem:[%s2695_s17 + $0x140] sm:$0xff]  ;;  %v2141_v39 = vld [vmem:[%s2695_s17 + $0x148] sm:$0xff]  ;;  %s2441_s21 = smov 8  }
  0x3e   : > { %s483_s8 = scalar_lea.vmem %s3989_s2, %s2615_s5  ;;  %s2625_s11 = scalar_lea.vmem %s3987_s0, %s2615_s5  ;;  %v710_v34 = vmax.f32 %v2139_v31, 0.0  ;;  %v711_v46 = vmax.f32 %v2140_v38, 0.0  ;;  %v712_v47 = vmax.f32 %v2141_v39, 0.0  ;;  %v2142_v52 = vld [vmem:[%s2695_s17 + $0x150] sm:$0xff]  ;;  %v2145_v25 = vld [vmem:[%s2695_s17 + $0x168] sm:$0xff] }
  0x3f   : > { %v526_v53 = vld [vmem:[%s483_s8 + $0x10] sm:$0xff]  ;;  %v524_v54 = vld [vmem:[%s483_s8] sm:$0xff]  ;;  %v527_v55 = vld [vmem:[%s483_s8 + $0x18] sm:$0xff]  ;;  %s2442_s23 = smov 16   ;;  %s2443_s24 = smov 32  }
  0x40   : > { %644 = vperm.xlu1 %2216, %v526_v53   ;;  %634 = vperm.xlu0 %2215, %v524_v54   ;;  %v525_v56 = vld [vmem:[%s483_s8 + $0x8] sm:$0xff]  ;;  %v528_v58 = vld [vmem:[%s483_s8 + $0x20] sm:$0xff]  ;;  %v531_v59 = vld [vmem:[%s483_s8 + $0x38] sm:$0xff]  ;;  %s3225_s27 = scalar_lea.vmem %s3990_s3, %s2615_s5  ;;  %s3818_s30 = scalar_lea.vmem %s3991_s4, %s2615_s5 }
  0x41   : > { %v529_v57 = vld [vmem:[%s483_s8 + $0x28] sm:$0xff]  ;;  %v530_v60 = vld [vmem:[%s483_s8 + $0x30] sm:$0xff]  ;;  %v532_v62 = vld [vmem:[%s483_s8 + $0x40] sm:$0xff] }
  0x42   : > { %v533_v61 = vld [vmem:[%s483_s8 + $0x48] sm:$0xff]  ;;  %v535_v63 = vld [vmem:[%s483_s8 + $0x58] sm:$0xff]  ;;  %v534_v0 = vld [vmem:[%s483_s8 + $0x50] sm:$0xff] }
  0x43   : > { %v536_v1 = vld [vmem:[%s483_s8 + $0x60] sm:$0xff]  ;;  %v2629_v3 = vld [vmem:[%s2625_s11 + $0x8] sm:$0xff]  ;;  %v2632_v4 = vld [vmem:[%s2625_s11 + $0x10] sm:$0xff] }
  0x44   : > { %649 = vperm.xlu1 %2216, %v527_v55   ;;  %639 = vperm.xlu0 %2215, %v525_v56   ;;  %v497_v2 = vld [vmem:[%s2625_s11] sm:$0xff]  ;;  %v2637_v5 = vld [vmem:[%s2625_s11 + $0x18] sm:$0xff]  ;;  %v2645_v7 = vld [vmem:[%s2625_s11 + $0x28] sm:$0xff] }
  0x45   : > { %v2640_v6 = vld [vmem:[%s2625_s11 + $0x20] sm:$0xff]  ;;  %v2648_v8 = vld [vmem:[%s2625_s11 + $0x30] sm:$0xff]  ;;  %v2653_v9 = vld [vmem:[%s2625_s11 + $0x38] sm:$0xff] }
  0x46   : > { %v2656_v10 = vld [vmem:[%s2625_s11 + $0x40] sm:$0xff]  ;;  %v2661_v11 = vld [vmem:[%s2625_s11 + $0x48] sm:$0xff]  ;;  %v2664_v12 = vld [vmem:[%s2625_s11 + $0x50] sm:$0xff] }
  0x47   : > { %v2669_v13 = vld [vmem:[%s2625_s11 + $0x58] sm:$0xff]  ;;  %v2672_v14 = vld [vmem:[%s2625_s11 + $0x60] sm:$0xff] }
  0x48   : > { %659 = vperm.xlu1 %2216, %v529_v57   ;;  %654 = vperm.xlu0 %2215, %v528_v58   ;;  %v2143_v53 = vld [vmem:[%s2695_s17 + $0x158] sm:$0xff] }
  0x4c   : > { %669 = vperm.xlu1 %2216, %v531_v59   ;;  %664 = vperm.xlu0 %2215, %v530_v60  }
  0x50   : > { %679 = vperm.xlu1 %2216, %v533_v61   ;;  %674 = vperm.xlu0 %2215, %v532_v62  }
  0x54   : > { %689 = vperm.xlu1 %2216, %v535_v63   ;;  %684 = vperm.xlu0 %2215, %v534_v0   ;;  %v713_v63 = vmax.f32 %v2142_v52, 0.0  ;;  %v714_v0 = vmax.f32 %v2143_v53, 0.0  ;;  %v2148_v53 = vld [vmem:[%s2695_s17 + $0x180] sm:$0xff] }
  0x58   : > { %694 = vperm.xlu0 %2215, %v536_v1   ;;  %552 = vrot.lane.b32.xlu1 %v497_v2, %s2437_s12 }
  0x5c   : > { %554 = vrot.lane.b32.xlu0 %v2629_v3, %s2437_s12  ;;  %556 = vrot.lane.b32.xlu1 %v2632_v4, %s2437_s12 }
  0x60   : > { %558 = vrot.lane.b32.xlu0 %v2637_v5, %s2437_s12  ;;  %560 = vrot.lane.b32.xlu1 %v2640_v6, %s2437_s12 }
  0x64   : > { %562 = vrot.lane.b32.xlu0 %v2645_v7, %s2437_s12  ;;  %564 = vrot.lane.b32.xlu1 %v2648_v8, %s2437_s12 }
  0x68   : > { %566 = vrot.lane.b32.xlu0 %v2653_v9, %s2437_s12  ;;  %568 = vrot.lane.b32.xlu1 %v2656_v10, %s2437_s12 }
  0x6c   : > { %570 = vrot.lane.b32.xlu0 %v2661_v11, %s2437_s12  ;;  %572 = vrot.lane.b32.xlu1 %v2664_v12, %s2437_s12 }
  0x70   : > { %574 = vrot.lane.b32.xlu0 %v2669_v13, %s2437_s12  ;;  %576 = vrot.lane.b32.xlu1 %v2672_v14, %s2437_s12 }
  0xbf   : > { %v645_v15 = vpop.permute.xlu1 %644  ;;  %v635_v16 = vpop.permute.xlu0 %634 }
  0xc3   : > { %v650_v17 = vpop.permute.xlu1 %649  ;;  %v640_v18 = vpop.permute.xlu0 %639 }
  0xc7   : > { %v2676_v19 = vpop.permute.xlu1 %659  ;;  %v655_v20 = vpop.permute.xlu0 %654 }
  0xcb   : > { %v2678_v21 = vpop.permute.xlu1 %669  ;;  %v2680_v22 = vpop.permute.xlu0 %664 }
  0xcf   : > { %v2683_v23 = vpop.permute.xlu1 %679  ;;  %v2685_v24 = vpop.permute.xlu0 %674 }
  0xd3   : > { %v2687_v26 = vpop.permute.xlu1 %689  ;;  %v2689_v27 = vpop.permute.xlu0 %684 }
  0xd7   : > { %v2693_v29 = vpop.permute.xlu0 %694  ;;  %v553_v30 = vpop.permute.xlu1 %552 }
  0xd8   : > { %v592_v32 = vsel %vm591_vm0, %v553_v30, %v497_v2 }
  0xd9   : > { %v606_v33 = vsub.f32 %v592_v32, %v497_v2 }
  0xdb   : > { %v619_v35 = vsel %vm605_vm1, 1e+10, %v606_v33  ;;  %v555_v36 = vpop.permute.xlu0 %554  ;;  %v557_v37 = vpop.permute.xlu1 %556 }
  0xdc   : > { %v697_v40 = vmul.f32 %v635_v16, %v619_v35  ;;  %v593_v41 = vsel %vm591_vm0, %v555_v36, %v2629_v3  ;;  %v594_v42 = vsel %vm591_vm0, %v557_v37, %v2632_v4  ;;  %v716_v37 = vmax.f32 %v2145_v25, 0.0 }
  0xdd   : > { %v607_v43 = vsub.f32 %v593_v41, %v2629_v3  ;;  %v608_v44 = vsub.f32 %v594_v42, %v2632_v4  ;;  %v2146_v41 = vld [vmem:[%s2695_s17 + $0x170] sm:$0xff]  ;;  %v2147_v42 = vld [vmem:[%s2695_s17 + $0x178] sm:$0xff] }
  0xde   : > { %v2710_v45 = vmul.f32 %v710_v34, %v697_v40  ;;  %v718_v52 = vmax.f32 %v2147_v42, 0.0 }
  0xdf   : > { %v620_v48 = vsel %vm605_vm1, 1e+10, %v607_v43  ;;  %v621_v49 = vsel %vm605_vm1, 1e+10, %v608_v44  ;;  %v559_v50 = vpop.permute.xlu0 %558  ;;  %v561_v51 = vpop.permute.xlu1 %560 }
  0xe0   : > { %v698_v54 = vmul.f32 %v640_v18, %v620_v48  ;;  %v699_v55 = vmul.f32 %v645_v15, %v621_v49  ;;  %v595_v56 = vsel %vm591_vm0, %v559_v50, %v2637_v5  ;;  %v596_v57 = vsel %vm591_vm0, %v561_v51, %v2640_v6 }
  0xe1   : > { %v609_v58 = vsub.f32 %v595_v56, %v2637_v5  ;;  %v610_v59 = vsub.f32 %v596_v57, %v2640_v6  ;;  %v736_v60 = vsub.f32 0.0, %v2710_v45  ;;  %v2144_v5 = vld [vmem:[%s2695_s17 + $0x160] sm:$0xff]  ;;  %v717_v51 = vmax.f32 %v2146_v41, 0.0  ;;  %v2149_v56 = vld [vmem:[%s2695_s17 + $0x188] sm:$0xff] }
  0xe2   : > { %v2725_v61 = vmul.f32 %v711_v46, %v698_v54  ;;  %v2727_v62 = vmul.f32 %v712_v47, %v699_v55 }
  0xe3   : > { %v622_v1 = vsel %vm605_vm1, 1e+10, %v609_v58  ;;  %v623_v2 = vsel %vm605_vm1, 1e+10, %v610_v59  ;;  %801 = vrot.lane.b32.xlu0 %v736_v60, %s2438_s15  ;;  %v563_v3 = vpop.permute.xlu0 %562  ;;  %v565_v4 = vpop.permute.xlu1 %564 }
  0xe4   : > { %v700_v6 = vmul.f32 %v650_v17, %v622_v1  ;;  %v701_v15 = vmul.f32 %v655_v20, %v623_v2  ;;  %v597_v16 = vsel %vm591_vm0, %v563_v3, %v2645_v7  ;;  %v598_v18 = vsel %vm591_vm0, %v565_v4, %v2648_v8 }
  0xe5   : > { %v611_v30 = vsub.f32 %v597_v16, %v2645_v7  ;;  %v612_v31 = vsub.f32 %v598_v18, %v2648_v8  ;;  %v737_v32 = vsub.f32 0.0, %v2725_v61  ;;  %v738_v33 = vsub.f32 0.0, %v2727_v62  ;;  %v2151_v16 = vld [vmem:[%s2695_s17 + $0x198] sm:$0xff] }
  0xe6   : > { %v2746_v34 = vmul.f32 %v713_v63, %v700_v6  ;;  %v2748_v17 = vmul.f32 %v714_v0, %v701_v15  ;;  %v715_v20 = vmax.f32 %v2144_v5, 0.0  ;;  %v719_v1 = vmax.f32 %v2148_v53, 0.0  ;;  %v2150_v6 = vld [vmem:[%s2695_s17 + $0x190] sm:$0xff] }
  0xe7   : > { %v624_v35 = vsel %vm605_vm1, 1e+10, %v611_v30  ;;  %v625_v36 = vsel %vm605_vm1, 1e+10, %v612_v31  ;;  %803 = vrot.lane.b32.xlu1 %v737_v32, %s2438_s15  ;;  %v567_v7 = vpop.permute.xlu0 %566  ;;  %v569_v8 = vpop.permute.xlu1 %568  ;;  %805 = vrot.lane.b32.xlu0 %v738_v33, %s2438_s15 }
  0xe8   : > { %v702_v38 = vmul.f32 %v2676_v19, %v624_v35  ;;  %v703_v39 = vmul.f32 %v2680_v22, %v625_v36  ;;  %v599_v40 = vsel %vm591_vm0, %v567_v7, %v2653_v9  ;;  %v600_v44 = vsel %vm591_vm0, %v569_v8, %v2656_v10 }
  0xe9   : > { %v613_v43 = vsub.f32 %v599_v40, %v2653_v9  ;;  %v739_v46 = vsub.f32 0.0, %v2746_v34  ;;  %v614_v19 = vsub.f32 %v600_v44, %v2656_v10  ;;  %v740_v22 = vsub.f32 0.0, %v2748_v17  ;;  %v1380_v34 = vld [vmem:[%s2695_s17] sm:$0xff] }
  0xea   : > { %v2772_v47 = vmul.f32 %v715_v20, %v702_v38  ;;  %v2779_v50 = vmul.f32 %v716_v37, %v703_v39  ;;  %v721_v35 = vmax.f32 %v2150_v6, 0.0 }
  0xeb   : > { %v626_v48 = vsel %vm605_vm1, 1e+10, %v613_v43  ;;  %807 = vrot.lane.b32.xlu1 %v739_v46, %s2438_s15  ;;  %v571_v9 = vpop.permute.xlu0 %570  ;;  %v573_v49 = vpop.permute.xlu1 %572  ;;  %v627_v54 = vsel %vm605_vm1, 1e+10, %v614_v19  ;;  %809 = vrot.lane.b32.xlu0 %v740_v22, %s2438_s15 }
  0xec   : > { %v704_v10 = vmul.f32 %v2678_v21, %v626_v48  ;;  %v601_v55 = vsel %vm591_vm0, %v571_v9, %v2661_v11  ;;  %v705_v57 = vmul.f32 %v2685_v24, %v627_v54  ;;  %v602_v59 = vsel %vm591_vm0, %v573_v49, %v2664_v12 }
  0xed   : > { %v615_v58 = vsub.f32 %v601_v55, %v2661_v11  ;;  %v616_v21 = vsub.f32 %v602_v59, %v2664_v12  ;;  %v741_v63 = vsub.f32 0.0, %v2772_v47  ;;  %v742_v0 = vsub.f32 0.0, %v2779_v50  ;;  %v1381_v47 = vld [vmem:[%s2695_s17 + $0x8] sm:$0xff] }
  0xee   : > { %v2800_v5 = vmul.f32 %v717_v51, %v704_v10  ;;  %v2802_v24 = vmul.f32 %v718_v52, %v705_v57  ;;  %v720_v11 = vmax.f32 %v2149_v56, 0.0  ;;  %v1393_v50 = vmul.f32 0.5, %v1380_v34 }
  0xef   : > { %v628_v2 = vsel %vm605_vm1, 1e+10, %v615_v58  ;;  %v575_v3 = vpop.permute.xlu0 %574  ;;  %v577_v4 = vpop.permute.xlu1 %576  ;;  %v629_v12 = vsel %vm605_vm1, 1e+10, %v616_v21  ;;  %811 = vrot.lane.b32.xlu1 %v741_v63, %s2438_s15  ;;  %813 = vrot.lane.b32.xlu0 %v742_v0, %s2438_s15  ;;  %v759_v45 = vmul.f32 1.442695, %v741_v63 }
  0xf0   : > { %v706_v15 = vmul.f32 %v2683_v23, %v628_v2  ;;  %v707_v18 = vmul.f32 %v2689_v27, %v629_v12  ;;  %v603_v25 = vsel %vm591_vm0, %v575_v3, %v2669_v13  ;;  %v604_v23 = vsel %vm591_vm0, %v577_v4, %v2672_v14  ;;  %v1382_v63 = vld [vmem:[%s2695_s17 + $0x10] sm:$0xff] }
  0xf1   : > { %v617_v30 = vsub.f32 %v603_v25, %v2669_v13  ;;  %v618_v31 = vsub.f32 %v604_v23, %v2672_v14  ;;  %v743_v20 = vsub.f32 0.0, %v2800_v5  ;;  %v744_v36 = vsub.f32 0.0, %v2802_v24  ;;  %v1383_v5 = vld [vmem:[%s2695_s17 + $0x18] sm:$0xff] }
  0xf2   : > { %v2824_v7 = vmul.f32 %v719_v1, %v706_v15  ;;  %v2826_v8 = vmul.f32 %v720_v11, %v707_v18  ;;  %v722_v27 = vmax.f32 %v2151_v16, 0.0 }
  0xf3   : > { %v630_v37 = vsel %vm605_vm1, 1e+10, %v617_v30  ;;  %v631_v38 = vsel %vm605_vm1, 1e+10, %v618_v31  ;;  %815 = vrot.lane.b32.xlu1 %v743_v20, %s2438_s15  ;;  %817 = vrot.lane.b32.xlu0 %v744_v36, %s2438_s15  ;;  %v763_v61 = vmul.f32 1.442695, %v743_v20 }
  0xf4   : > { %v708_v13 = vmul.f32 %v2687_v26, %v630_v37  ;;  %v709_v14 = vmul.f32 %v2693_v29, %v631_v38  ;;  %v745_v39 = vsub.f32 0.0, %v2824_v7  ;;  %v746_v40 = vsub.f32 0.0, %v2826_v8  ;;  %v1384_v7 = vld [vmem:[%s2695_s17 + $0x20] sm:$0xff] }
  0xf5   : > { %v765_v62 = vmul.f32 1.442695, %v744_v36  ;;  %v1394_v36 = vmul.f32 0.5, %v1381_v47 }
  0xf6   : > { %v2842_v41 = vmul.f32 %v721_v35, %v708_v13  ;;  %v2844_v28 = vmul.f32 %v722_v27, %v709_v14 }
  0xf7   : > { %819 = vrot.lane.b32.xlu1 %v745_v39, %s2438_s15  ;;  %821 = vrot.lane.b32.xlu0 %v746_v40, %s2438_s15 }
  0xf8   : > { %v747_v26 = vsub.f32 0.0, %v2842_v41  ;;  %v748_v29 = vsub.f32 0.0, %v2844_v28  ;;  %v1396_v28 = vmul.f32 0.5, %v1383_v5  ;;  %v2158_v5 = vld [vmem:[%s2695_s17 + $0x98] sm:$0xff] }
  0xfa   : > { %v771_v17 = vmul.f32 1.442695, %v747_v26 }
  0xfb   : > { %823 = vrot.lane.b32.xlu1 %v747_v26, %s2438_s15  ;;  %825 = vrot.lane.b32.xlu0 %v748_v29, %s2438_s15  ;;  %v1386_v26 = vld [vmem:[%s2695_s17 + $0x30] sm:$0xff] }
 0x155   : > { %v802_v42 = vpop.permute.xlu0 %801 }
 0x156   : > { %v841_v43 = vsel %vm840_vm2, 0.0, %v802_v42 }
 0x157   : > { %867 = vrot.lane.b32.xlu1 %v841_v43, %s2438_s15 }
 0x159   : > { %v804_v44 = vpop.permute.xlu1 %803  ;;  %v806_v19 = vpop.permute.xlu0 %805 }
 0x15a   : > { %v842_v48 = vsel %vm840_vm2, 0.0, %v804_v44  ;;  %v843_v9 = vsel %vm840_vm2, 0.0, %v806_v19 }
 0x15b   : > { %869 = vrot.lane.b32.xlu0 %v842_v48, %s2438_s15  ;;  %871 = vrot.lane.b32.xlu1 %v843_v9, %s2438_s15 }
 0x15d   : > { %v808_v49 = vpop.permute.xlu1 %807  ;;  %v810_v51 = vpop.permute.xlu0 %809 }
 0x15e   : > { %v844_v52 = vsel %vm840_vm2, 0.0, %v808_v49  ;;  %v845_v53 = vsel %vm840_vm2, 0.0, %v810_v51 }
 0x15f   : > { %873 = vrot.lane.b32.xlu0 %v844_v52, %s2438_s15  ;;  %875 = vrot.lane.b32.xlu1 %v845_v53, %s2438_s15 }
 0x161   : > { %v812_v10 = vpop.permute.xlu1 %811  ;;  %v814_v54 = vpop.permute.xlu0 %813 }
 0x162   : > { %v846_v55 = vsel %vm840_vm2, 0.0, %v812_v10  ;;  %v847_v56 = vsel %vm840_vm2, 0.0, %v814_v54 }
 0x163   : > { %877 = vrot.lane.b32.xlu0 %v846_v55, %s2438_s15  ;;  %879 = vrot.lane.b32.xlu1 %v847_v56, %s2438_s15 }
 0x165   : > { %v816_v57 = vpop.permute.xlu1 %815  ;;  %v818_v58 = vpop.permute.xlu0 %817 }
 0x166   : > { %v848_v59 = vsel %vm840_vm2, 0.0, %v816_v57  ;;  %v849_v21 = vsel %vm840_vm2, 0.0, %v818_v58 }
 0x167   : > { %881 = vrot.lane.b32.xlu0 %v848_v59, %s2438_s15  ;;  %883 = vrot.lane.b32.xlu1 %v849_v21, %s2438_s15 }
 0x169   : > { %v820_v1 = vpop.permute.xlu1 %819  ;;  %v822_v2 = vpop.permute.xlu0 %821 }
 0x16a   : > { %v850_v3 = vsel %vm840_vm2, 0.0, %v820_v1  ;;  %v851_v4 = vsel %vm840_vm2, 0.0, %v822_v2 }
 0x16b   : > { %885 = vrot.lane.b32.xlu0 %v850_v3, %s2438_s15  ;;  %887 = vrot.lane.b32.xlu1 %v851_v4, %s2438_s15 }
 0x16d   : > { %v824_v11 = vpop.permute.xlu1 %823  ;;  %v826_v6 = vpop.permute.xlu0 %825 }
 0x16e   : > { %v852_v15 = vsel %vm840_vm2, 0.0, %v824_v11  ;;  %v853_v12 = vsel %vm840_vm2, 0.0, %v826_v6 }
 0x16f   : > { %889 = vrot.lane.b32.xlu0 %v852_v15, %s2438_s15  ;;  %891 = vrot.lane.b32.xlu1 %v853_v12, %s2438_s15 }
 0x1c9   : > { %v868_v16 = vpop.permute.xlu1 %867 }
 0x1ca   : > { %v906_v18 = vsel %vm840_vm2, 0.0, %v868_v16 }
 0x1cb   : > { %v919_v25 = vadd.f32 %v906_v18, %v841_v43 }
 0x1cd   : > { %945 = vrot.lane.b32.xlu0 %v919_v25, %s2439_s18  ;;  %v870_v23 = vpop.permute.xlu0 %869  ;;  %v872_v30 = vpop.permute.xlu1 %871 }
 0x1ce   : > { %v907_v31 = vsel %vm840_vm2, 0.0, %v870_v23  ;;  %v908_v35 = vsel %vm840_vm2, 0.0, %v872_v30 }
 0x1cf   : > { %v920_v27 = vadd.f32 %v907_v31, %v842_v48  ;;  %v921_v37 = vadd.f32 %v908_v35, %v843_v9 }
 0x1d1   : > { %947 = vrot.lane.b32.xlu1 %v920_v27, %s2439_s18  ;;  %v874_v38 = vpop.permute.xlu0 %873  ;;  %949 = vrot.lane.b32.xlu0 %v921_v37, %s2439_s18  ;;  %v876_v13 = vpop.permute.xlu1 %875 }
 0x1d2   : > { %v909_v14 = vsel %vm840_vm2, 0.0, %v874_v38  ;;  %v910_v42 = vsel %vm840_vm2, 0.0, %v876_v13 }
 0x1d3   : > { %v922_v43 = vadd.f32 %v909_v14, %v844_v52  ;;  %v923_v44 = vadd.f32 %v910_v42, %v845_v53 }
 0x1d5   : > { %951 = vrot.lane.b32.xlu1 %v922_v43, %s2439_s18  ;;  %953 = vrot.lane.b32.xlu0 %v923_v44, %s2439_s18  ;;  %v880_v19 = vpop.permute.xlu1 %879  ;;  %v878_v49 = vpop.permute.xlu0 %877 }
 0x1d6   : > { %v912_v48 = vsel %vm840_vm2, 0.0, %v880_v19  ;;  %v911_v9 = vsel %vm840_vm2, 0.0, %v878_v49 }
 0x1d7   : > { %v925_v51 = vadd.f32 %v912_v48, %v847_v56  ;;  %v924_v10 = vadd.f32 %v911_v9, %v846_v55 }
 0x1d9   : > { %957 = vrot.lane.b32.xlu0 %v925_v51, %s2439_s18  ;;  %955 = vrot.lane.b32.xlu1 %v924_v10, %s2439_s18  ;;  %v882_v54 = vpop.permute.xlu0 %881  ;;  %v884_v57 = vpop.permute.xlu1 %883 }
 0x1da   : > { %v913_v52 = vsel %vm840_vm2, 0.0, %v882_v54  ;;  %v914_v53 = vsel %vm840_vm2, 0.0, %v884_v57 }
 0x1db   : > { %v926_v58 = vadd.f32 %v913_v52, %v848_v59  ;;  %v927_v1 = vadd.f32 %v914_v53, %v849_v21 }
 0x1dd   : > { %959 = vrot.lane.b32.xlu1 %v926_v58, %s2439_s18  ;;  %v886_v2 = vpop.permute.xlu0 %885  ;;  %961 = vrot.lane.b32.xlu0 %v927_v1, %s2439_s18  ;;  %v888_v11 = vpop.permute.xlu1 %887 }
 0x1de   : > { %v915_v55 = vsel %vm840_vm2, 0.0, %v886_v2  ;;  %v916_v56 = vsel %vm840_vm2, 0.0, %v888_v11 }
 0x1df   : > { %v928_v6 = vadd.f32 %v915_v55, %v850_v3  ;;  %v929_v16 = vadd.f32 %v916_v56, %v851_v4 }
 0x1e1   : > { %963 = vrot.lane.b32.xlu1 %v928_v6, %s2439_s18  ;;  %v890_v18 = vpop.permute.xlu0 %889  ;;  %965 = vrot.lane.b32.xlu0 %v929_v16, %s2439_s18  ;;  %v892_v23 = vpop.permute.xlu1 %891 }
 0x1e2   : > { %v917_v59 = vsel %vm840_vm2, 0.0, %v890_v18  ;;  %v918_v21 = vsel %vm840_vm2, 0.0, %v892_v23 }
 0x1e3   : > { %v930_v30 = vadd.f32 %v917_v59, %v852_v15  ;;  %v931_v31 = vadd.f32 %v918_v21, %v853_v12 }
 0x1e5   : > { %967 = vrot.lane.b32.xlu1 %v930_v30, %s2439_s18  ;;  %969 = vrot.lane.b32.xlu0 %v931_v31, %s2439_s18 }
 0x23f   : > { %v946_v35 = vpop.permute.xlu0 %945 }
 0x240   : > { %v985_v3 = vsel %vm984_vm3, 0.0, %v946_v35 }
 0x241   : > { %v998_v4 = vadd.f32 %v985_v3, %v919_v25 }
 0x243   : > { %v948_v38 = vpop.permute.xlu1 %947  ;;  %1024 = vrot.lane.b32.xlu1 %v998_v4, %s2440_s20  ;;  %v950_v14 = vpop.permute.xlu0 %949 }
 0x244   : > { %v986_v13 = vsel %vm984_vm3, 0.0, %v948_v38  ;;  %v987_v15 = vsel %vm984_vm3, 0.0, %v950_v14 }
 0x245   : > { %v999_v42 = vadd.f32 %v986_v13, %v920_v27  ;;  %v1000_v12 = vadd.f32 %v987_v15, %v921_v37 }
 0x247   : > { %1026 = vrot.lane.b32.xlu0 %v999_v42, %s2440_s20  ;;  %v952_v19 = vpop.permute.xlu1 %951  ;;  %1028 = vrot.lane.b32.xlu1 %v1000_v12, %s2440_s20  ;;  %v954_v48 = vpop.permute.xlu0 %953 }
 0x248   : > { %v988_v49 = vsel %vm984_vm3, 0.0, %v952_v19  ;;  %v989_v9 = vsel %vm984_vm3, 0.0, %v954_v48 }
 0x249   : > { %v1001_v25 = vadd.f32 %v988_v49, %v922_v43  ;;  %v1002_v54 = vadd.f32 %v989_v9, %v923_v44 }
 0x24b   : > { %1030 = vrot.lane.b32.xlu0 %v1001_v25, %s2440_s20  ;;  %v956_v57 = vpop.permute.xlu1 %955  ;;  %1032 = vrot.lane.b32.xlu1 %v1002_v54, %s2440_s20  ;;  %v958_v27 = vpop.permute.xlu0 %957 }
 0x24c   : > { %v990_v37 = vsel %vm984_vm3, 0.0, %v956_v57  ;;  %v991_v52 = vsel %vm984_vm3, 0.0, %v958_v27 }
 0x24d   : > { %v1003_v53 = vadd.f32 %v990_v37, %v924_v10  ;;  %v1004_v2 = vadd.f32 %v991_v52, %v925_v51 }
 0x24f   : > { %1034 = vrot.lane.b32.xlu0 %v1003_v53, %s2440_s20  ;;  %v960_v11 = vpop.permute.xlu1 %959  ;;  %1036 = vrot.lane.b32.xlu1 %v1004_v2, %s2440_s20  ;;  %v962_v44 = vpop.permute.xlu0 %961 }
 0x250   : > { %v992_v43 = vsel %vm984_vm3, 0.0, %v960_v11  ;;  %v993_v56 = vsel %vm984_vm3, 0.0, %v962_v44 }
 0x251   : > { %v1005_v55 = vadd.f32 %v992_v43, %v926_v58  ;;  %v1006_v18 = vadd.f32 %v993_v56, %v927_v1 }
 0x253   : > { %1038 = vrot.lane.b32.xlu0 %v1005_v55, %s2440_s20  ;;  %v964_v23 = vpop.permute.xlu1 %963  ;;  %1040 = vrot.lane.b32.xlu1 %v1006_v18, %s2440_s20  ;;  %v966_v51 = vpop.permute.xlu0 %965 }
 0x254   : > { %v994_v59 = vsel %vm984_vm3, 0.0, %v964_v23  ;;  %v995_v21 = vsel %vm984_vm3, 0.0, %v966_v51 }
 0x255   : > { %v1007_v10 = vadd.f32 %v994_v59, %v928_v6  ;;  %v1008_v35 = vadd.f32 %v995_v21, %v929_v16 }
 0x257   : > { %1042 = vrot.lane.b32.xlu0 %v1007_v10, %s2440_s20  ;;  %v968_v3 = vpop.permute.xlu1 %967  ;;  %1044 = vrot.lane.b32.xlu1 %v1008_v35, %s2440_s20  ;;  %v970_v1 = vpop.permute.xlu0 %969 }
 0x258   : > { %v996_v58 = vsel %vm984_vm3, 0.0, %v968_v3  ;;  %v997_v13 = vsel %vm984_vm3, 0.0, %v970_v1 }
 0x259   : > { %v1009_v38 = vadd.f32 %v996_v58, %v930_v30  ;;  %v1010_v14 = vadd.f32 %v997_v13, %v931_v31 }
 0x25b   : > { %1046 = vrot.lane.b32.xlu0 %v1009_v38, %s2440_s20  ;;  %1048 = vrot.lane.b32.xlu1 %v1010_v14, %s2440_s20 }
 0x2b5   : > { %v1025_v6 = vpop.permute.xlu1 %1024 }
 0x2b6   : > { %v1064_v16 = vsel %vm1063_vm4, 0.0, %v1025_v6 }
 0x2b7   : > { %v1077_v15 = vadd.f32 %v1064_v16, %v998_v4 }
 0x2b9   : > { %1103 = vrot.lane.b32.xlu0 %v1077_v15, %s2441_s21  ;;  %v1027_v19 = vpop.permute.xlu0 %1026  ;;  %v1029_v49 = vpop.permute.xlu1 %1028 }
 0x2ba   : > { %v1065_v48 = vsel %vm1063_vm4, 0.0, %v1027_v19  ;;  %v1066_v30 = vsel %vm1063_vm4, 0.0, %v1029_v49 }
 0x2bb   : > { %v1078_v9 = vadd.f32 %v1065_v48, %v999_v42  ;;  %v1079_v31 = vadd.f32 %v1066_v30, %v1000_v12 }
 0x2bd   : > { %1105 = vrot.lane.b32.xlu1 %v1078_v9, %s2441_s21  ;;  %v1031_v57 = vpop.permute.xlu0 %1030  ;;  %1107 = vrot.lane.b32.xlu0 %v1079_v31, %s2441_s21  ;;  %v1033_v27 = vpop.permute.xlu1 %1032 }
 0x2be   : > { %v1067_v37 = vsel %vm1063_vm4, 0.0, %v1031_v57  ;;  %v1068_v4 = vsel %vm1063_vm4, 0.0, %v1033_v27 }
 0x2bf   : > { %v1080_v52 = vadd.f32 %v1067_v37, %v1001_v25  ;;  %v1081_v11 = vadd.f32 %v1068_v4, %v1002_v54 }
 0x2c1   : > { %1109 = vrot.lane.b32.xlu1 %v1080_v52, %s2441_s21  ;;  %1111 = vrot.lane.b32.xlu0 %v1081_v11, %s2441_s21  ;;  %v1037_v43 = vpop.permute.xlu1 %1036  ;;  %v1035_v44 = vpop.permute.xlu0 %1034 }
 0x2c2   : > { %v1070_v42 = vsel %vm1063_vm4, 0.0, %v1037_v43  ;;  %v1069_v12 = vsel %vm1063_vm4, 0.0, %v1035_v44 }
 0x2c3   : > { %v1083_v56 = vadd.f32 %v1070_v42, %v1004_v2  ;;  %v1082_v23 = vadd.f32 %v1069_v12, %v1003_v53 }
 0x2c5   : > { %1115 = vrot.lane.b32.xlu0 %v1083_v56, %s2441_s21  ;;  %1113 = vrot.lane.b32.xlu1 %v1082_v23, %s2441_s21  ;;  %v1039_v59 = vpop.permute.xlu0 %1038  ;;  %v1041_v51 = vpop.permute.xlu1 %1040 }
 0x2c6   : > { %v1071_v25 = vsel %vm1063_vm4, 0.0, %v1039_v59  ;;  %v1072_v54 = vsel %vm1063_vm4, 0.0, %v1041_v51 }
 0x2c7   : > { %v1084_v21 = vadd.f32 %v1071_v25, %v1005_v55  ;;  %v1085_v3 = vadd.f32 %v1072_v54, %v1006_v18 }
 0x2c9   : > { %1117 = vrot.lane.b32.xlu1 %v1084_v21, %s2441_s21  ;;  %v1043_v58 = vpop.permute.xlu0 %1042  ;;  %1119 = vrot.lane.b32.xlu0 %v1085_v3, %s2441_s21  ;;  %v1045_v1 = vpop.permute.xlu1 %1044 }
 0x2ca   : > { %v1073_v53 = vsel %vm1063_vm4, 0.0, %v1043_v58  ;;  %v1074_v2 = vsel %vm1063_vm4, 0.0, %v1045_v1 }
 0x2cb   : > { %v1086_v13 = vadd.f32 %v1073_v53, %v1007_v10  ;;  %v1087_v6 = vadd.f32 %v1074_v2, %v1008_v35 }
 0x2cd   : > { %1121 = vrot.lane.b32.xlu1 %v1086_v13, %s2441_s21  ;;  %v1047_v16 = vpop.permute.xlu0 %1046  ;;  %1123 = vrot.lane.b32.xlu0 %v1087_v6, %s2441_s21  ;;  %v1049_v19 = vpop.permute.xlu1 %1048 }
 0x2ce   : > { %v1075_v55 = vsel %vm1063_vm4, 0.0, %v1047_v16  ;;  %v1076_v18 = vsel %vm1063_vm4, 0.0, %v1049_v19 }
 0x2cf   : > { %v1088_v49 = vadd.f32 %v1075_v55, %v1009_v38  ;;  %v1089_v48 = vadd.f32 %v1076_v18, %v1010_v14 }
 0x2d1   : > { %1125 = vrot.lane.b32.xlu1 %v1088_v49, %s2441_s21  ;;  %1127 = vrot.lane.b32.xlu0 %v1089_v48, %s2441_s21 }
 0x32b   : > { %v1104_v30 = vpop.permute.xlu0 %1103 }
 0x32c   : > { %v1143_v10 = vsel %vm1142_vm5, 0.0, %v1104_v30 }
 0x32d   : > { %v1156_v35 = vadd.f32 %v1143_v10, %v1077_v15 }
 0x32f   : > { %v1106_v57 = vpop.permute.xlu1 %1105  ;;  %1182 = vrot.lane.b32.xlu1 %v1156_v35, %s2442_s23  ;;  %v1108_v37 = vpop.permute.xlu0 %1107 }
 0x330   : > { %v1144_v27 = vsel %vm1142_vm5, 0.0, %v1106_v57  ;;  %v1145_v38 = vsel %vm1142_vm5, 0.0, %v1108_v37 }
 0x331   : > { %v1157_v4 = vadd.f32 %v1144_v27, %v1078_v9  ;;  %v1158_v14 = vadd.f32 %v1145_v38, %v1079_v31 }
 0x333   : > { %1184 = vrot.lane.b32.xlu0 %v1157_v4, %s2442_s23  ;;  %v1110_v43 = vpop.permute.xlu1 %1109  ;;  %1186 = vrot.lane.b32.xlu1 %v1158_v14, %s2442_s23  ;;  %v1112_v42 = vpop.permute.xlu0 %1111 }
 0x334   : > { %v1146_v44 = vsel %vm1142_vm5, 0.0, %v1110_v43  ;;  %v1147_v12 = vsel %vm1142_vm5, 0.0, %v1112_v42 }
 0x335   : > { %v1159_v15 = vadd.f32 %v1146_v44, %v1080_v52  ;;  %v1160_v59 = vadd.f32 %v1147_v12, %v1081_v11 }
 0x337   : > { %1188 = vrot.lane.b32.xlu0 %v1159_v15, %s2442_s23  ;;  %v1114_v51 = vpop.permute.xlu1 %1113  ;;  %1190 = vrot.lane.b32.xlu1 %v1160_v59, %s2442_s23  ;;  %v1116_v9 = vpop.permute.xlu0 %1115 }
 0x338   : > { %v1148_v31 = vsel %vm1142_vm5, 0.0, %v1114_v51  ;;  %v1149_v25 = vsel %vm1142_vm5, 0.0, %v1116_v9 }
 0x339   : > { %v1161_v54 = vadd.f32 %v1148_v31, %v1082_v23  ;;  %v1162_v58 = vadd.f32 %v1149_v25, %v1083_v56 }
 0x33b   : > { %1192 = vrot.lane.b32.xlu0 %v1161_v54, %s2442_s23  ;;  %v1118_v1 = vpop.permute.xlu1 %1117  ;;  %1194 = vrot.lane.b32.xlu1 %v1162_v58, %s2442_s23  ;;  %v1120_v11 = vpop.permute.xlu0 %1119 }
 0x33c   : > { %v1150_v52 = vsel %vm1142_vm5, 0.0, %v1118_v1  ;;  %v1151_v2 = vsel %vm1142_vm5, 0.0, %v1120_v11 }
 0x33d   : > { %v1163_v53 = vadd.f32 %v1150_v52, %v1084_v21  ;;  %v1164_v16 = vadd.f32 %v1151_v2, %v1085_v3 }
 0x33f   : > { %1196 = vrot.lane.b32.xlu0 %v1163_v53, %s2442_s23  ;;  %v1122_v19 = vpop.permute.xlu1 %1121  ;;  %1198 = vrot.lane.b32.xlu1 %v1164_v16, %s2442_s23  ;;  %v1124_v56 = vpop.permute.xlu0 %1123 }
 0x340   : > { %v1152_v55 = vsel %vm1142_vm5, 0.0, %v1122_v19  ;;  %v1153_v18 = vsel %vm1142_vm5, 0.0, %v1124_v56 }
 0x341   : > { %v1165_v23 = vadd.f32 %v1152_v55, %v1086_v13  ;;  %v1166_v30 = vadd.f32 %v1153_v18, %v1087_v6 }
 0x343   : > { %1200 = vrot.lane.b32.xlu0 %v1165_v23, %s2442_s23  ;;  %v1126_v10 = vpop.permute.xlu1 %1125  ;;  %1202 = vrot.lane.b32.xlu1 %v1166_v30, %s2442_s23  ;;  %v1128_v3 = vpop.permute.xlu0 %1127 }
 0x344   : > { %v1154_v21 = vsel %vm1142_vm5, 0.0, %v1126_v10  ;;  %v1155_v27 = vsel %vm1142_vm5, 0.0, %v1128_v3 }
 0x345   : > { %v1167_v57 = vadd.f32 %v1154_v21, %v1088_v49  ;;  %v1168_v37 = vadd.f32 %v1155_v27, %v1089_v48 }
 0x347   : > { %1204 = vrot.lane.b32.xlu0 %v1167_v57, %s2442_s23  ;;  %1206 = vrot.lane.b32.xlu1 %v1168_v37, %s2442_s23 }
 0x3a1   : > { %v1183_v13 = vpop.permute.xlu1 %1182 }
 0x3a2   : > { %v1222_v6 = vsel %vm1221_vm6, 0.0, %v1183_v13 }
 0x3a3   : > { %v2991_v38 = vadd.f32 %v1222_v6, %v1156_v35 }
 0x3a5   : > { %1261 = vrot.lane.b32.xlu0 %v2991_v38, %s2443_s24  ;;  %v1185_v43 = vpop.permute.xlu0 %1184  ;;  %v1187_v44 = vpop.permute.xlu1 %1186 }
 0x3a6   : > { %v1223_v49 = vsel %vm1221_vm6, 0.0, %v1185_v43  ;;  %v1224_v48 = vsel %vm1221_vm6, 0.0, %v1187_v44 }
 0x3a7   : > { %v2997_v42 = vadd.f32 %v1223_v49, %v1157_v4  ;;  %v2999_v12 = vadd.f32 %v1224_v48, %v1158_v14  ;;  %v753_v48 = vmul.f32 1.442695, %v738_v33  ;;  %v769_v33 = vmul.f32 1.442695, %v746_v40  ;;  %v1385_v40 = vld [vmem:[%s2695_s17 + $0x28] sm:$0xff] }
 0x3a9   : > { %1263 = vrot.lane.b32.xlu1 %v2997_v42, %s2443_s24  ;;  %v1189_v51 = vpop.permute.xlu0 %1188  ;;  %1265 = vrot.lane.b32.xlu0 %v2999_v12, %s2443_s24  ;;  %v1191_v35 = vpop.permute.xlu1 %1190 }
 0x3aa   : > { %v1225_v9 = vsel %vm1221_vm6, 0.0, %v1189_v51  ;;  %v1226_v31 = vsel %vm1221_vm6, 0.0, %v1191_v35  ;;  %v1397_v51 = vmul.f32 0.5, %v1384_v7  ;;  %v1387_v35 = vld [vmem:[%s2695_s17 + $0x38] sm:$0xff]  ;;  %v2171_v7 = vld [vmem:[%s2695_s17 + $0x100] sm:$0xff] }
 0x3ab   : > { %v3007_v25 = vadd.f32 %v1225_v9, %v1159_v15  ;;  %v3009_v1 = vadd.f32 %v1226_v31, %v1160_v59  ;;  %v1398_v31 = vmul.f32 0.5, %v1385_v40 }
 0x3ad   : > { %1267 = vrot.lane.b32.xlu1 %v3007_v25, %s2443_s24  ;;  %1269 = vrot.lane.b32.xlu0 %v3009_v1, %s2443_s24  ;;  %v1195_v4 = vpop.permute.xlu1 %1194  ;;  %v1193_v14 = vpop.permute.xlu0 %1192 }
 0x3ae   : > { %v1228_v52 = vsel %vm1221_vm6, 0.0, %v1195_v4  ;;  %v1227_v11 = vsel %vm1221_vm6, 0.0, %v1193_v14  ;;  %v1388_v4 = vld [vmem:[%s2695_s17 + $0x40] sm:$0xff] }
 0x3af   : > { %v3017_v2 = vadd.f32 %v1228_v52, %v1162_v58  ;;  %v3019_v19 = vadd.f32 %v1227_v11, %v1161_v54  ;;  %v1399_v52 = vmul.f32 0.5, %v1386_v26  ;;  %v2155_v11 = vld [vmem:[%s2695_s17 + $0x80] sm:$0xff] }
 0x3b1   : > { %1273 = vrot.lane.b32.xlu0 %v3017_v2, %s2443_s24  ;;  %1271 = vrot.lane.b32.xlu1 %v3019_v19, %s2443_s24  ;;  %v1197_v15 = vpop.permute.xlu0 %1196  ;;  %v1199_v59 = vpop.permute.xlu1 %1198 }
 0x3b2   : > { %v1229_v55 = vsel %vm1221_vm6, 0.0, %v1197_v15  ;;  %v1230_v56 = vsel %vm1221_vm6, 0.0, %v1199_v59  ;;  %v1400_v59 = vmul.f32 0.5, %v1387_v35 }
 0x3b3   : > { %v3027_v18 = vadd.f32 %v1229_v55, %v1163_v53  ;;  %v3029_v10 = vadd.f32 %v1230_v56, %v1164_v16  ;;  %v1389_v55 = vld [vmem:[%s2695_s17 + $0x48] sm:$0xff] }
 0x3b5   : > { %1275 = vrot.lane.b32.xlu1 %v3027_v18, %s2443_s24  ;;  %v1201_v54 = vpop.permute.xlu0 %1200  ;;  %1277 = vrot.lane.b32.xlu0 %v3029_v10, %s2443_s24  ;;  %v1203_v58 = vpop.permute.xlu1 %1202 }
 0x3b6   : > { %v1231_v21 = vsel %vm1221_vm6, 0.0, %v1201_v54  ;;  %v1232_v3 = vsel %vm1221_vm6, 0.0, %v1203_v58  ;;  %v1401_v54 = vmul.f32 0.5, %v1388_v4  ;;  %v2153_v58 = vld [vmem:[%s2695_s17 + $0x70] sm:$0xff] }
 0x3b7   : > { %v3037_v27 = vadd.f32 %v1231_v21, %v1165_v23  ;;  %v3039_v13 = vadd.f32 %v1232_v3, %v1166_v30  ;;  %v749_v23 = vmul.f32 1.442695, %v736_v60  ;;  %v751_v30 = vmul.f32 1.442695, %v737_v32  ;;  %v1390_v3 = vld [vmem:[%s2695_s17 + $0x50] sm:$0xff] }
 0x3b8   : > { %v761_v60 = vmul.f32 1.442695, %v742_v0  ;;  %v767_v32 = vmul.f32 1.442695, %v745_v39  ;;  %v1395_v39 = vmul.f32 0.5, %v1382_v63 }
 0x3b9   : > { %1279 = vrot.lane.b32.xlu1 %v3037_v27, %s2443_s24  ;;  %v1205_v53 = vpop.permute.xlu0 %1204  ;;  %1281 = vrot.lane.b32.xlu0 %v3039_v13, %s2443_s24  ;;  %v1207_v16 = vpop.permute.xlu1 %1206  ;;  %2217 = vpow2.f32 %v749_v23 }
 0x3ba   : > { %v1233_v6 = vsel %vm1221_vm6, 0.0, %v1205_v53  ;;  %v1234_v43 = vsel %vm1221_vm6, 0.0, %v1207_v16  ;;  %2219 = vpow2.f32 %v751_v30  ;;  %v1514_v53 = vmul.f32 0.5, %v2155_v11 }
 0x3bb   : > { %v3047_v44 = vadd.f32 %v1233_v6, %v1167_v57  ;;  %v3049_v49 = vadd.f32 %v1234_v43, %v1168_v37  ;;  %v755_v57 = vmul.f32 1.442695, %v739_v46  ;;  %v757_v37 = vmul.f32 1.442695, %v740_v22  ;;  %v2152_v46 = vld [vmem:[%s2695_s17 + $0x68] sm:$0xff]  ;;  %v2157_v43 = vld [vmem:[%s2695_s17 + $0x90] sm:$0xff] }
 0x3bc   : > { %2221 = vpow2.f32 %v753_v48  ;;  %v773_v22 = vmul.f32 1.442695, %v748_v29  ;;  %v1511_v24 = vmul.f32 0.5, %v2152_v46  ;;  %v1402_v6 = vmul.f32 0.5, %v1389_v55  ;;  %v2156_v48 = vld [vmem:[%s2695_s17 + $0x88] sm:$0xff]  ;;  %v2154_v46 = vld [vmem:[%s2695_s17 + $0x78] sm:$0xff] }
 0x3bd   : > { %1283 = vrot.lane.b32.xlu1 %v3047_v44, %s2443_s24  ;;  %1285 = vrot.lane.b32.xlu0 %v3049_v49, %s2443_s24  ;;  %2223 = vpow2.f32 %v755_v57  ;;  %v1512_v30 = vmul.f32 0.5, %v2153_v58  ;;  %v1513_v35 = vmul.f32 0.5, %v2154_v46  ;;  %v1517_v55 = vmul.f32 0.5, %v2158_v5 }
 0x3be   : > { %2225 = vpow2.f32 %v757_v37  ;;  %v1403_v37 = vmul.f32 0.5, %v1390_v3  ;;  %vm1941_vm6 = vcmask 23552  }
 0x3bf   : > { %2227 = vpow2.f32 %v759_v45  ;;  %v2165_v45 = vld [vmem:[%s2695_s17 + $0xd0] sm:$0xff] }
 0x3c0   : > { %2229 = vpow2.f32 %v761_v60 }
 0x3c1   : > { %2231 = vpow2.f32 %v763_v61 }
 0x3c2   : > { %2233 = vpow2.f32 %v765_v62  ;;  %v1391_v62 = vld [vmem:[%s2695_s17 + $0x58] sm:$0xff] }
 0x3c3   : > { %2235 = vpow2.f32 %v767_v32  ;;  %v3085_v0 = vpop.eup %2217  ;;  %v1516_v32 = vmul.f32 0.5, %v2157_v43  ;;  %v1404_v40 = vmul.f32 0.5, %v1391_v62 }
 0x3c4   : > { %2237 = vpow2.f32 %v769_v33  ;;  %v3088_v20 = vpop.eup %2219 }
 0x3c5   : > { %2239 = vpow2.f32 %v771_v17 }
 0x3c6   : > { %v3091_v8 = vpop.eup %2221  ;;  %2241 = vpow2.f32 %v773_v22  ;;  %v1515_v22 = vmul.f32 0.5, %v2156_v48 }
 0x3c7   : > { %v3094_v41 = vpop.eup %2223  ;;  %2243 = vtanh.f32 %v1393_v50  ;;  %v1635_v50 = vmul.f32 0.5, %v2171_v7 }
 0x3c8   : > { %v3097_v29 = vpop.eup %2225  ;;  %2245 = vtanh.f32 %v1511_v24  ;;  %v1629_v24 = vmul.f32 0.5, %v2165_v45 }
 0x3c9   : > { %v3100_v9 = vpop.eup %2227  ;;  %2247 = vtanh.f32 %v1394_v36 }
 0x3ca   : > { %v3103_v14 = vpop.eup %2229  ;;  %2249 = vtanh.f32 %v1395_v39 }
 0x3cb   : > { %v3106_v15 = vpop.eup %2231  ;;  %2251 = vtanh.f32 %v1396_v28 }
 0x3cc   : > { %v3109_v56 = vpop.eup %2233  ;;  %2253 = vtanh.f32 %v1397_v51  ;;  %v2168_v51 = vld [vmem:[%s2695_s17 + $0xe8] sm:$0xff] }
 0x3cd   : > { %v3112_v21 = vpop.eup %2235  ;;  %2255 = vtanh.f32 %v1398_v31  ;;  %v2167_v31 = vld [vmem:[%s2695_s17 + $0xe0] sm:$0xff] }
 0x3ce   : > { %v3115_v16 = vpop.eup %2237  ;;  %2257 = vtanh.f32 %v1399_v52  ;;  %v1631_v45 = vmul.f32 0.5, %v2167_v31 }
 0x3cf   : > { %v3118_v23 = vpop.eup %2239  ;;  %2259 = vtanh.f32 %v1400_v59  ;;  %v1392_v59 = vld [vmem:[%s2695_s17 + $0x60] sm:$0xff] }
 0x3d0   : > { %v3121_v57 = vpop.eup %2241  ;;  %2261 = vtanh.f32 %v1401_v54  ;;  %v1405_v46 = vmul.f32 0.5, %v1392_v59 }
 0x3d1   : > { %v2244_v60 = vpop.eup %2243  ;;  %2263 = vtanh.f32 %v1514_v53 }
 0x3d2   : > { %v3126_v33 = vpop.eup %2245  ;;  %2265 = vtanh.f32 %v1402_v6  ;;  %v1419_v3 = vmul.f32 0.5, %v2244_v60  ;;  %v2159_v6 = vld [vmem:[%s2695_s17 + $0xa0] sm:$0xff] }
 0x3d3   : > { %3992 = vst [vmem:[#allocation3_spill] sm:$0xff] %v3126_v33  ;;  %v2248_v47 = vpop.eup %2247  ;;  %2267 = vtanh.f32 %v1512_v30 }
 0x3d4   : > { %v2250_v36 = vpop.eup %2249  ;;  %2269 = vtanh.f32 %v1403_v37  ;;  %v1420_v58 = vmul.f32 0.5, %v2248_v47  ;;  %v2160_v37 = vld [vmem:[%s2695_s17 + $0xa8] sm:$0xff] }
 0x3d5   : > { %v2252_v28 = vpop.eup %2251  ;;  %2271 = vtanh.f32 %v1516_v32  ;;  %v1421_v53 = vmul.f32 0.5, %v2250_v36  ;;  %v2161_v36 = vld [vmem:[%s2695_s17 + $0xb0] sm:$0xff]  ;;  %v1519_v48 = vmul.f32 0.5, %v2160_v37 }
 0x3d6   : > { %v2254_v4 = vpop.eup %2253  ;;  %2273 = vtanh.f32 %v1515_v22  ;;  %v1422_v32 = vmul.f32 0.5, %v2252_v28  ;;  %v2166_v22 = vld [vmem:[%s2695_s17 + $0xd8] sm:$0xff]  ;;  %v3148_v11 = vadd.f32 0.5, %v1420_v58 }
 0x3d7   : > { %v2256_v54 = vpop.eup %2255  ;;  %2275 = vtanh.f32 %v1629_v24  ;;  %v1423_v47 = vmul.f32 0.5, %v2254_v4  ;;  %v1518_v24 = vmul.f32 0.5, %v2159_v6  ;;  %v3152_v31 = vadd.f32 0.5, %v1421_v53  ;;  %v2162_v28 = vld [vmem:[%s2695_s17 + $0xb8] sm:$0xff] }
 0x3d8   : > { %v2258_v43 = vpop.eup %2257  ;;  %2277 = vtanh.f32 %v1404_v40  ;;  %v1424_v5 = vmul.f32 0.5, %v2256_v54  ;;  %v3150_v40 = vadd.f32 0.5, %v1419_v3  ;;  %v1630_v4 = vmul.f32 0.5, %v2166_v22  ;;  %v2169_v54 = vld [vmem:[%s2695_s17 + $0xf0] sm:$0xff] }
 0x3d9   : > { %v2260_v62 = vpop.eup %2259  ;;  %2279 = vtanh.f32 %v1513_v35  ;;  %v1425_v35 = vmul.f32 0.5, %v2258_v43  ;;  %v1520_v3 = vmul.f32 0.5, %v2161_v36  ;;  %v3161_v26 = vadd.f32 0.5, %v1423_v47  ;;  %v2163_v43 = vld [vmem:[%s2695_s17 + $0xc0] sm:$0xff] }
 0x3da   : > { %v2262_v60 = vpop.eup %2261  ;;  %2281 = vtanh.f32 %v1517_v55  ;;  %v1426_v52 = vmul.f32 0.5, %v2260_v62  ;;  %v3158_v55 = vadd.f32 0.5, %v1422_v32  ;;  %v3163_v37 = vadd.f32 0.5, %v1424_v5 }
 0x3db   : > { %v2264_v30 = vpop.eup %2263  ;;  %2283 = vtanh.f32 %v1631_v45  ;;  %v1427_v58 = vmul.f32 0.5, %v2262_v60  ;;  %v1521_v62 = vmul.f32 0.5, %v2162_v28  ;;  %v1633_v32 = vmul.f32 0.5, %v2169_v54 }
 0x3dc   : > { %v2266_v59 = vpop.eup %2265  ;;  %2285 = vtanh.f32 %v1405_v46  ;;  %v1540_v39 = vmul.f32 0.5, %v2264_v30  ;;  %v3167_v60 = vadd.f32 0.5, %v1425_v35  ;;  %v3169_v46 = vadd.f32 0.5, %v1426_v52  ;;  %v2173_v52 = vld [vmem:[%s2695_s17 + $0x110] sm:$0xff] }
 0x3dd   : > { %v3156_v6 = vpop.eup %2267  ;;  %2287 = vtanh.f32 %v1518_v24  ;;  %v1428_v22 = vmul.f32 0.5, %v2266_v59  ;;  %v1632_v47 = vmul.f32 0.5, %v2168_v51  ;;  %v3171_v24 = vadd.f32 0.5, %v1427_v58 }
 0x3de   : > { %3993 = vst [vmem:[#allocation4_spill] sm:$0xff] %v3156_v6  ;;  %v2270_v53 = vpop.eup %2269  ;;  %2289 = vtanh.f32 %v1519_v48  ;;  %v1522_v30 = vmul.f32 0.5, %v2163_v43  ;;  %v2170_v48 = vld [vmem:[%s2695_s17 + $0xf8] sm:$0xff]  ;;  %v3183_v58 = vadd.f32 0.5, %v1540_v39  ;;  %v1637_v61 = vmul.f32 0.5, %v2173_v52  ;;  %v2175_v6 = vld [vmem:[%s2695_s17 + $0x120] sm:$0xff] }
 0x3df   : > { %v2272_v45 = vpop.eup %2271  ;;  %2291 = vtanh.f32 %v1630_v4  ;;  %3994 = vst [vmem:[#allocation5_spill] sm:$0xff] %v3171_v24  ;;  %v3173_v28 = vmul.f32 0.5, %v2270_v53  ;;  %v3181_v4 = vadd.f32 0.5, %v1428_v22  ;;  %v2172_v53 = vld [vmem:[%s2695_s17 + $0x108] sm:$0xff] }
 0x3e0   : > { %v2274_v63 = vpop.eup %2273  ;;  %2293 = vtanh.f32 %v1520_v3  ;;  %v1542_v35 = vmul.f32 0.5, %v2272_v45 }
 0x3e1   : > { %v2276_v5 = vpop.eup %2275  ;;  %3995 = vst [vmem:[#allocation6_spill] sm:$0xff] %v3173_v28  ;;  %2295 = vtanh.f32 %v1521_v62  ;;  %v1541_v43 = vmul.f32 0.5, %v2274_v63 }
 0x3e2   : > { %v2278_v59 = vpop.eup %2277  ;;  %2297 = vtanh.f32 %v1633_v32  ;;  %v1655_v34 = vmul.f32 0.5, %v2276_v5  ;;  %v1636_v32 = vmul.f32 0.5, %v2172_v53 }
 0x3e3   : > { %v3178_v17 = vpop.eup %2279  ;;  %2299 = vtanh.f32 %v1632_v47  ;;  %v3186_v7 = vmul.f32 0.5, %v2278_v59  ;;  %v2174_v59 = vld [vmem:[%s2695_s17 + $0x118] sm:$0xff] }
 0x3e4   : > { %3996 = vst [vmem:[#allocation7_spill] sm:$0xff] %v3178_v17  ;;  %v2282_v3 = vpop.eup %2281  ;;  %2301 = vtanh.f32 %v1522_v30 }
 0x3e5   : > { %2303 = vtanh.f32 %v1635_v50 }
 0x417   : > { %v1262_v36 = vpop.permute.xlu0 %1261 }
 0x418   : > { %v1301_v54 = vsel %vm1300_vm7, 0.0, %v1262_v36  ;;  %v1634_v36 = vmul.f32 0.5, %v2170_v48  ;;  %v1543_v48 = vmul.f32 0.5, %v2282_v3 }
 0x419   : > { %v1314_v51 = vadd.f32 %v1301_v54, %v2991_v38  ;;  %v2284_v38 = vpop.eup %2283  ;;  %v3189_v54 = vadd.f32 0.5, %v1542_v35  ;;  %v3200_v35 = vadd.f32 0.5, %v1655_v34 }
 0x41a   : > { %v3192_v63 = vpop.eup %2285 }
 0x41b   : > { %v1327_v45 = vmul.f32 1.442695, %v1314_v51  ;;  %v1264_v62 = vpop.permute.xlu1 %1263  ;;  %v1266_v39 = vpop.permute.xlu0 %1265  ;;  %3997 = vst [vmem:[#allocation8_spill] sm:$0xff] %v3192_v63  ;;  %v3198_v51 = vadd.f32 0.5, %v1541_v43  ;;  %v1638_v43 = vmul.f32 0.5, %v2174_v59  ;;  %v2176_v63 = vld [vmem:[%s2695_s17 + $0x128] sm:$0xff] }
 0x41c   : > { %v1302_v22 = vsel %vm1300_vm7, 0.0, %v1264_v62  ;;  %v1303_v5 = vsel %vm1300_vm7, 0.0, %v1266_v39  ;;  %v2288_v30 = vpop.eup %2287 }
 0x41d   : > { %2305 = vpow2.f32 %v1327_v45  ;;  %v1315_v47 = vadd.f32 %v1302_v22, %v2997_v42  ;;  %v1316_v52 = vadd.f32 %v1303_v5, %v2999_v12  ;;  %v2290_v50 = vpop.eup %2289  ;;  %v1657_v45 = vmul.f32 0.5, %v2284_v38  ;;  %v2164_v12 = vld [vmem:[%s2695_s17 + $0xc8] sm:$0xff]  ;;  %v2177_v38 = vld [vmem:[%s2695_s17 + $0x130] sm:$0xff] }
 0x41e   : > { %2307 = vtanh.f32 %v1634_v36  ;;  %v1639_v42 = vmul.f32 0.5, %v2175_v6  ;;  %v2292_v22 = vpop.eup %2291  ;;  %v3206_v5 = vadd.f32 0.5, %v1543_v48  ;;  %v1641_v33 = vmul.f32 0.5, %v2177_v38 }
 0x41f   : > { %v1329_v53 = vmul.f32 1.442695, %v1315_v47  ;;  %v1268_v62 = vpop.permute.xlu1 %1267  ;;  %2309 = vtanh.f32 %v1637_v61  ;;  %v1331_v3 = vmul.f32 1.442695, %v1316_v52  ;;  %v1270_v17 = vpop.permute.xlu0 %1269  ;;  %v1544_v52 = vmul.f32 0.5, %v2288_v30 }
 0x420   : > { %v1304_v39 = vsel %vm1300_vm7, 0.0, %v1268_v62  ;;  %2311 = vtanh.f32 %v1636_v32  ;;  %v2294_v34 = vpop.eup %2293  ;;  %v1305_v47 = vsel %vm1300_vm7, 0.0, %v1270_v17  ;;  %v1545_v62 = vmul.f32 0.5, %v2290_v50 }
 0x421   : > { %2313 = vpow2.f32 %v1329_v53  ;;  %v1317_v36 = vadd.f32 %v1304_v39, %v3007_v25  ;;  %v2296_v61 = vpop.eup %2295  ;;  %v1318_v6 = vadd.f32 %v1305_v47, %v3009_v1  ;;  %v1523_v32 = vmul.f32 0.5, %v2164_v12 }
 0x422   : > { %2315 = vpow2.f32 %v1331_v3  ;;  %v2298_v28 = vpop.eup %2297  ;;  %v3211_v59 = vadd.f32 0.5, %v1657_v45  ;;  %v1656_v48 = vmul.f32 0.5, %v2292_v22  ;;  %v1640_v50 = vmul.f32 0.5, %v2176_v63 }
 0x423   : > { %v1333_v24 = vmul.f32 1.442695, %v1317_v36  ;;  %2317 = vtanh.f32 %v1639_v42  ;;  %v2300_v53 = vpop.eup %2299  ;;  %v1335_v25 = vmul.f32 1.442695, %v1318_v6  ;;  %v1272_v39 = vpop.permute.xlu1 %1271  ;;  %v3219_v12 = vadd.f32 0.5, %v1544_v52 }
 0x424   : > { %v1274_v17 = vpop.permute.xlu0 %1273  ;;  %2319 = vtanh.f32 %v1638_v43  ;;  %v2302_v3 = vpop.eup %2301  ;;  %v1306_v1 = vsel %vm1300_vm7, 0.0, %v1272_v39  ;;  %v3227_v22 = vadd.f32 0.5, %v1545_v62  ;;  %v1547_v63 = vmul.f32 0.5, %v2296_v61 }
 0x425   : > { %2321 = vpow2.f32 %v1333_v24  ;;  %v1307_v30 = vsel %vm1300_vm7, 0.0, %v1274_v17  ;;  %v3215_v36 = vpop.eup %2303  ;;  %v1319_v45 = vadd.f32 %v1306_v1, %v3019_v19  ;;  %v1546_v24 = vmul.f32 0.5, %v2294_v34 }
 0x426   : > { %2323 = vpow2.f32 %v1335_v25  ;;  %v1320_v42 = vadd.f32 %v1307_v30, %v3017_v2  ;;  %v3998_v38 = vsub.f32 1.0, %v3085_v0  ;;  %v3236_v34 = vadd.f32 0.5, %v1656_v48 }
 0x427   : > { %v2306_v47 = vpop.eup %2305  ;;  %2325 = vtanh.f32 %v1523_v32  ;;  %v1337_v2 = vmul.f32 1.442695, %v1319_v45  ;;  %v1276_v52 = vpop.permute.xlu1 %1275  ;;  %v1659_v62 = vmul.f32 0.5, %v2298_v28  ;;  %v3248_v28 = vadd.f32 0.5, %v1546_v24 }
 0x428   : > { %v2308_v43 = vpop.eup %2307  ;;  %v3231_v19 = vmul.f32 %v2306_v47, %v3998_v38  ;;  %v1339_v6 = vmul.f32 1.442695, %v1320_v42  ;;  %2327 = vtanh.f32 %v1641_v33  ;;  %v1308_v39 = vsel %vm1300_vm7, 0.0, %v1276_v52  ;;  %v1278_v17 = vpop.permute.xlu0 %1277 }
 0x429   : > { %v3233_v25 = vpop.eup %2309  ;;  %2329 = vtanh.f32 %v1640_v50  ;;  %v1321_v0 = vadd.f32 %v1308_v39, %v3027_v18  ;;  %v1309_v32 = vsel %vm1300_vm7, 0.0, %v1278_v17  ;;  %v1658_v30 = vmul.f32 0.5, %v2300_v53 }
 0x42a   : > { %v3238_v61 = vpop.eup %2311  ;;  %1367 = vst.msk [vmem:[%s3225_s27] sm:$0xff] %vm1366_vm8, %v3231_v19  ;;  %2331 = vpow2.f32 %v1337_v2  ;;  %v1733_v33 = vsel %vm1366_vm8, %v3231_v19, 0.0  ;;  %v1322_v48 = vadd.f32 %v1309_v32, %v3029_v10  ;;  %v3999_v45 = vsub.f32 1.0, %v3088_v20 }
 0x42b   : > { %v2314_v1 = vpop.eup %2313  ;;  %2333 = vpow2.f32 %v1339_v6  ;;  %1734 = vadd.xlane.f32.xlu0 %v1733_v33  ;;  %v1341_v18 = vmul.f32 1.442695, %v1321_v0  ;;  %v1280_v47 = vpop.permute.xlu1 %1279  ;;  %v1548_v38 = vmul.f32 0.5, %v2302_v3  ;;  %v3254_v2 = vadd.f32 0.5, %v1547_v63 }
 0x42c   : > { %v2316_v50 = vpop.eup %2315  ;;  %v3252_v42 = vmul.f32 %v2314_v1, %v3999_v45  ;;  %v4000_v6 = vsub.f32 1.0, %v3091_v8  ;;  %v1343_v39 = vmul.f32 1.442695, %v1322_v48  ;;  %v1310_v24 = vsel %vm1300_vm7, 0.0, %v1280_v47  ;;  %v1282_v53 = vpop.permute.xlu0 %1281 }
 0x42d   : > { %v2318_v52 = vpop.eup %2317  ;;  %v3261_v17 = vadd.f32 0.5, %v1659_v62  ;;  %2335 = vpow2.f32 %v1341_v18  ;;  %v1323_v3 = vadd.f32 %v1310_v24, %v3037_v27  ;;  %v1311_v63 = vsel %vm1300_vm7, 0.0, %v1282_v53 }
 0x42e   : > { %v3258_v10 = vmul.f32 %v2316_v50, %v4000_v6  ;;  %v2320_v20 = vpop.eup %2319  ;;  %1368 = vst.msk [vmem:[%s3225_s27 + $0x8] sm:$0xff] %vm1366_vm8, %v3252_v42  ;;  %v1736_v8 = vsel %vm1366_vm8, %v3252_v42, 0.0  ;;  %2337 = vpow2.f32 %v1343_v39  ;;  %v1324_v62 = vadd.f32 %v1311_v63, %v3039_v13 }
 0x42f   : > { %v2322_v0 = vpop.eup %2321  ;;  %1737 = vadd.xlane.f32.xlu1 %v1736_v8  ;;  %v3276_v33 = vadd.f32 0.5, %v1658_v30  ;;  %v4001_v1 = vsub.f32 1.0, %v3094_v41  ;;  %v1345_v50 = vmul.f32 1.442695, %v1323_v3  ;;  %v1284_v45 = vpop.permute.xlu1 %1283  ;;  %v3282_v18 = vadd.f32 0.5, %v1548_v38 }
 0x430   : > { %1369 = vst.msk [vmem:[%s3225_s27 + $0x10] sm:$0xff] %vm1366_vm8, %v3258_v10  ;;  %v1739_v32 = vsel %vm1366_vm8, %v3258_v10, 0.0  ;;  %v2324_v27 = vpop.eup %2323  ;;  %v1661_v13 = vmul.f32 0.5, %v3215_v36  ;;  %v4002_v6 = vsub.f32 1.0, %v3097_v29  ;;  %v1347_v30 = vmul.f32 1.442695, %v1324_v62  ;;  %v1286_v53 = vpop.permute.xlu0 %1285 }
 0x431   : > { %v3280_v48 = vmul.f32 %v2322_v0, %v4001_v1  ;;  %1740 = vadd.xlane.f32.xlu0 %v1739_v32  ;;  %v2326_v47 = vpop.eup %2325  ;;  %v1312_v24 = vsel %vm1300_vm7, 0.0, %v1284_v45  ;;  %v1660_v41 = vmul.f32 0.5, %v2308_v43  ;;  %2339 = vpow2.f32 %v1345_v50 }
 0x432   : > { %v3287_v39 = vmul.f32 %v2324_v27, %v4002_v6  ;;  %v2328_v63 = vpop.eup %2327  ;;  %v1325_v38 = vadd.f32 %v1312_v24, %v3047_v44  ;;  %v1313_v3 = vsel %vm1300_vm7, 0.0, %v1286_v53  ;;  %2341 = vpow2.f32 %v1347_v30 }
 0x433   : > { %1370 = vst.msk [vmem:[%s3225_s27 + $0x18] sm:$0xff] %vm1366_vm8, %v3280_v48  ;;  %v1742_v36 = vsel %vm1366_vm8, %v3280_v48, 0.0  ;;  %v2330_v29 = vpop.eup %2329  ;;  %v1326_v8 = vadd.f32 %v1313_v3, %v3049_v49  ;;  %v1663_v0 = vmul.f32 0.5, %v3233_v25  ;;  %v1662_v32 = vmul.f32 0.5, %v3238_v61 }
 0x434   : > { %1371 = vst.msk [vmem:[%s3225_s27 + $0x20] sm:$0xff] %vm1366_vm8, %v3287_v39  ;;  %1743 = vadd.xlane.f32.xlu1 %v1742_v36  ;;  %v1745_v43 = vsel %vm1366_vm8, %v3287_v39, 0.0  ;;  %v2332_v44 = vpop.eup %2331  ;;  %v1349_v62 = vmul.f32 1.442695, %v1325_v38  ;;  %v1665_v27 = vmul.f32 0.5, %v2318_v52  ;;  %v1664_v1 = vmul.f32 0.5, %v2320_v20 }
 0x435   : > { %1746 = vadd.xlane.f32.xlu0 %v1745_v43  ;;  %v2334_v50 = vpop.eup %2333  ;;  %v4003_v45 = vsub.f32 1.0, %v3100_v9  ;;  %v1351_v49 = vmul.f32 1.442695, %v1326_v8  ;;  %v1549_v30 = vmul.f32 0.5, %v2326_v47  ;;  %v3309_v24 = vadd.f32 0.5, %v1661_v13  ;;  %v2399_v43 = vld [vmem:[%s2625_s11 + $0x18] sm:$0xff] }
 0x436   : > { %v4004_v25 = vsub.f32 1.0, %v3103_v14  ;;  %2343 = vpow2.f32 %v1349_v62  ;;  %v3315_v38 = vadd.f32 0.5, %v1660_v41  ;;  %v1667_v61 = vmul.f32 0.5, %v2328_v63 }
 0x437   : > { %v3307_v6 = vmul.f32 %v2332_v44, %v4003_v45  ;;  %2345 = vpow2.f32 %v1351_v49  ;;  %v3322_v52 = vadd.f32 0.5, %v1663_v0  ;;  %v1666_v20 = vmul.f32 0.5, %v2330_v29  ;;  %v2336_v13 = vpop.eup %2335 }
 0x438   : > { %v3313_v53 = vmul.f32 %v2334_v50, %v4004_v25  ;;  %v3329_v47 = vadd.f32 0.5, %v1662_v32  ;;  %v3331_v41 = vadd.f32 0.5, %v1665_v27  ;;  %v3333_v63 = vadd.f32 0.5, %v1664_v1  ;;  %v2338_v3 = vpop.eup %2337  ;;  %v2400_v27 = vld [vmem:[%s2625_s11 + $0x10] sm:$0xff]  ;;  %v2401_v1 = vld [vmem:[%s2625_s11 + $0x28] sm:$0xff] }
 0x439   : > { %1372 = vst.msk [vmem:[%s3225_s27 + $0x28] sm:$0xff] %vm1366_vm8, %v3307_v6  ;;  %v1748_v9 = vsel %vm1366_vm8, %v3307_v6, 0.0  ;;  %v4005_v36 = vsub.f32 1.0, %v3106_v15  ;;  %v1445_v8 = vmul.f32 %v3150_v40, %v3231_v19  ;;  %v1775_v0 = vmul.f32 %v2399_v43, %v3280_v48 }
 0x43a   : > { %1373 = vst.msk [vmem:[%s3225_s27 + $0x30] sm:$0xff] %vm1366_vm8, %v3313_v53  ;;  %1749 = vadd.xlane.f32.xlu1 %v1748_v9  ;;  %v1751_v14 = vsel %vm1366_vm8, %v3313_v53, 0.0  ;;  %v3343_v44 = vadd.f32 0.5, %v1549_v30  ;;  %v4006_v62 = vsub.f32 1.0, %v3109_v56  ;;  %v1774_v15 = vmul.f32 %v2400_v27, %v3258_v10  ;;  %v2402_v56 = vld [vmem:[%s2625_s11 + $0x20] sm:$0xff]  ;;  %v2403_v27 = vld [vmem:[%s2625_s11 + $0x38] sm:$0xff] }
 0x43b   : > { %v3337_v29 = vmul.f32 %v2336_v13, %v4005_v36  ;;  %1752 = vadd.xlane.f32.xlu0 %v1751_v14  ;;  %v1777_v50 = vmul.f32 %v2401_v1, %v3307_v6  ;;  %v3353_v45 = vadd.f32 0.5, %v1667_v61  ;;  %v3361_v49 = vsel %vm1366_vm8, %v1775_v0, 0.0  ;;  %v2340_v9 = vpop.eup %2339 }
 0x43c   : > { %v3347_v32 = vmul.f32 %v2338_v3, %v4006_v62  ;;  %v1776_v30 = vmul.f32 %v2402_v56, %v3287_v39  ;;  %v3365_v25 = vadd.f32 0.5, %v1666_v20  ;;  %v3373_v13 = vsel %vm1366_vm8, %v1774_v15, 0.0  ;;  %v2342_v3 = vpop.eup %2341  ;;  %v2405_v56 = vld [vmem:[%s2625_s11 + $0x40] sm:$0xff] }
 0x43d   : > { %1374 = vst.msk [vmem:[%s3225_s27 + $0x38] sm:$0xff] %vm1366_vm8, %v3337_v29  ;;  %v1754_v40 = vsel %vm1366_vm8, %v3337_v29, 0.0  ;;  %v3376_v14 = vsel %vm1366_vm8, %v1777_v50, 0.0  ;;  %v3380_v20 = vmul.f32 %v3200_v35, %v3231_v19  ;;  %v4007_v36 = vsub.f32 1.0, %v3112_v21  ;;  %v2404_v50 = vld [vmem:[%s2625_s11 + $0x30] sm:$0xff] }
 0x43e   : > { %1375 = vst.msk [vmem:[%s3225_s27 + $0x40] sm:$0xff] %vm1366_vm8, %v3347_v32  ;;  %1755 = vadd.xlane.f32.xlu1 %v1754_v40  ;;  %v1757_v61 = vsel %vm1366_vm8, %v3347_v32, 0.0  ;;  %v1458_v0 = vsel %vm1366_vm8, %v1445_v8, 0.0  ;;  %v3388_v62 = vsel %vm1366_vm8, %v1776_v30, 0.0  ;;  %v1779_v15 = vmul.f32 %v2403_v27, %v3337_v29 }
 0x43f   : > { %v3384_v43 = vmul.f32 %v2340_v9, %v4007_v36  ;;  %1758 = vadd.xlane.f32.xlu0 %v1757_v61  ;;  %v4008_v1 = vsub.f32 1.0, %v3115_v16  ;;  %v1446_v21 = vmul.f32 %v3148_v11, %v3252_v42  ;;  %v1778_v40 = vmul.f32 %v2404_v50, %v3313_v53  ;;  %v2406_v11 = vld [vmem:[%s2625_s11 + $0x48] sm:$0xff] }
 0x440   : > { %v1780_v8 = vmul.f32 %v2405_v56, %v3347_v32  ;;  %v1447_v16 = vmul.f32 %v3152_v31, %v3258_v10  ;;  %v3410_v9 = vsel %vm1366_vm8, %v1779_v15, 0.0  ;;  %v1448_v27 = vmul.f32 %v3158_v55, %v3280_v48  ;;  %v2407_v55 = vld [vmem:[%s2625_s11 + $0x50] sm:$0xff] }
 0x441   : > { %v3394_v35 = vmul.f32 %v2342_v3, %v4008_v1  ;;  %1376 = vst.msk [vmem:[%s3225_s27 + $0x48] sm:$0xff] %vm1366_vm8, %v3384_v43  ;;  %v1760_v30 = vsel %vm1366_vm8, %v3384_v43, 0.0  ;;  %4009 = vst [vmem:[#allocation9_spill] sm:$0xff] %v3410_v9  ;;  %v1781_v61 = vmul.f32 %v2406_v11, %v3384_v43  ;;  %v2344_v3 = vpop.eup %2343  ;;  %v3422_v31 = vsel %vm1366_vm8, %v1778_v40, 0.0 }
 0x442   : > { %1761 = vadd.xlane.f32.xlu1 %v1760_v30  ;;  %v3425_v15 = vsel %vm1366_vm8, %v1780_v8, 0.0  ;;  %v2346_v1 = vpop.eup %2345  ;;  %v4010_v50 = vsub.f32 1.0, %v3118_v23  ;;  %v1449_v30 = vmul.f32 %v3161_v26, %v3287_v39  ;;  %v4011_v9 = vsub.f32 1.0, %v3121_v57  ;;  %v2408_v57 = vld [vmem:[%s2625_s11 + $0x58] sm:$0xff] }
 0x443   : > { %1377 = vst.msk [vmem:[%s3225_s27 + $0x50] sm:$0xff] %vm1366_vm8, %v3394_v35  ;;  %v1763_v36 = vsel %vm1366_vm8, %v3394_v35, 0.0  ;;  %v3434_v11 = vsel %vm1366_vm8, %v1781_v61, 0.0  ;;  %v1782_v40 = vmul.f32 %v2407_v55, %v3394_v35  ;;  %v1461_v23 = vsel %vm1366_vm8, %v1446_v21, 0.0 }
 0x444   : > { %v3429_v56 = vmul.f32 %v2344_v3, %v4010_v50  ;;  %1764 = vadd.xlane.f32.xlu0 %v1763_v36  ;;  %v3440_v8 = vmul.f32 %v2346_v1, %v4011_v9  ;;  %v1566_v3 = vmul.f32 %v3183_v58, %v3280_v48  ;;  %v1568_v36 = vmul.f32 %v3189_v54, %v3307_v6  ;;  %v2409_v50 = vld [vmem:[%s2625_s11 + $0x60] sm:$0xff] }
 0x445   : > { %v1464_v61 = vsel %vm1366_vm8, %v1447_v16, 0.0  ;;  %v3456_v1 = vsel %vm1366_vm8, %v1782_v40, 0.0  ;;  %v1467_v54 = vsel %vm1366_vm8, %v1448_v27, 0.0  ;;  %v1470_v55 = vsel %vm1366_vm8, %v1449_v30, 0.0 }
 0x446   : > { %1378 = vst.msk [vmem:[%s3225_s27 + $0x58] sm:$0xff] %vm1366_vm8, %v3429_v56  ;;  %v1766_v26 = vsel %vm1366_vm8, %v3429_v56, 0.0  ;;  %v1783_v9 = vmul.f32 %v2408_v57, %v3429_v56  ;;  %1379 = vst.msk [vmem:[%s3225_s27 + $0x60] sm:$0xff] %vm1366_vm8, %v3440_v8  ;;  %v1769_v58 = vsel %vm1366_vm8, %v3440_v8, 0.0  ;;  %v3465_v21 = vsel %vm1366_vm8, %v1566_v3, 0.0 }
 0x447   : > { %1767 = vadd.xlane.f32.xlu1 %v1766_v26  ;;  %v1784_v16 = vmul.f32 %v2409_v50, %v3440_v8  ;;  %v3474_v57 = vsel %vm1366_vm8, %v1568_v36, 0.0  ;;  %v1567_v26 = vmul.f32 %v3198_v51, %v3287_v39  ;;  %v1450_v27 = vmul.f32 %v3163_v37, %v3307_v6 }
 0x448   : > { %1770 = vadd.xlane.f32.xlu0 %v1769_v58  ;;  %v3471_v40 = vsel %vm1366_vm8, %v1783_v9, 0.0  ;;  %v1570_v58 = vmul.f32 %v3219_v12, %v3337_v29  ;;  %v1569_v30 = vmul.f32 %v3206_v5, %v3313_v53  ;;  %v1572_v36 = vmul.f32 %v3248_v28, %v3384_v43 }
 0x449   : > { %v3481_v3 = vsel %vm1366_vm8, %v1784_v16, 0.0  ;;  %v3488_v9 = vsel %vm1366_vm8, %v1567_v26, 0.0  ;;  %v1571_v51 = vmul.f32 %v3227_v22, %v3347_v32  ;;  %v1574_v37 = vmul.f32 %v3282_v18, %v3429_v56 }
 0x44a   : > { %v3497_v50 = vsel %vm1366_vm8, %v1570_v58, 0.0  ;;  %v3500_v12 = vsel %vm1366_vm8, %v1569_v30, 0.0  ;;  %v1573_v5 = vmul.f32 %v3254_v2, %v3394_v35  ;;  %v3506_v16 = vsel %vm1366_vm8, %v3380_v20, 0.0 }
 0x44b   : > { %1459 = vadd.xlane.f32.xlu1 %v1458_v0  ;;  %v3509_v22 = vsel %vm1366_vm8, %v1572_v36, 0.0  ;;  %v3512_v28 = vsel %vm1366_vm8, %v1571_v51, 0.0  ;;  %v3515_v18 = vsel %vm1366_vm8, %v1574_v37, 0.0  ;;  %v1575_v0 = vmul.f32 %v3343_v44, %v3440_v8 }
 0x44c   : > { %1462 = vadd.xlane.f32.xlu0 %v1461_v23  ;;  %v3520_v26 = vsel %vm1366_vm8, %v1573_v5, 0.0  ;;  %v1683_v2 = vmul.f32 %v3211_v59, %v3258_v10  ;;  %v1682_v20 = vmul.f32 %v3236_v34, %v3252_v42  ;;  %v1685_v23 = vmul.f32 %v3261_v17, %v3287_v39 }
 0x44d   : > { %v3529_v58 = vsel %vm1366_vm8, %v1575_v0, 0.0  ;;  %v1684_v30 = vmul.f32 %v3276_v33, %v3280_v48  ;;  %v1687_v44 = vmul.f32 %v3309_v24, %v3313_v53  ;;  %v1686_v36 = vmul.f32 %v3315_v38, %v3307_v6 }
 0x44e   : > { %v3538_v59 = vsel %vm1366_vm8, %v1683_v2, 0.0  ;;  %v3541_v34 = vsel %vm1366_vm8, %v1682_v20, 0.0  ;;  %v3544_v17 = vsel %vm1366_vm8, %v1685_v23, 0.0  ;;  %v1689_v39 = vmul.f32 %v3322_v52, %v3347_v32  ;;  %v4013_v20 = vld [vmem:[#allocation5_spill] sm:$0xff] }
 0x44f   : > { %1468 = vadd.xlane.f32.xlu1 %v1467_v54  ;;  %v3549_v33 = vsel %vm1366_vm8, %v1684_v30, 0.0  ;;  %v3552_v48 = vsel %vm1366_vm8, %v1687_v44, 0.0  ;;  %v3555_v6 = vsel %vm1366_vm8, %v1686_v36, 0.0  ;;  %v1688_v24 = vmul.f32 %v3329_v47, %v3337_v29  ;;  %v4014_v30 = vld [vmem:[#allocation6_spill] sm:$0xff]  ;;  %v4015_v44 = vld [vmem:[#allocation8_spill] sm:$0xff] }
 0x450   : > { %1465 = vadd.xlane.f32.xlu0 %v1464_v61  ;;  %v3560_v38 = vsel %vm1366_vm8, %v1689_v39, 0.0  ;;  %v1691_v54 = vmul.f32 %v3331_v41, %v3394_v35  ;;  %v1690_v52 = vmul.f32 %v3333_v63, %v3384_v43  ;;  %v1693_v61 = vmul.f32 %v3353_v45, %v3440_v8 }
 0x451   : > { %v1473_v51 = vsel %vm1366_vm8, %v1450_v27, 0.0  ;;  %v1452_v37 = vmul.f32 %v3169_v46, %v3337_v29  ;;  %v3572_v5 = vsel %vm1366_vm8, %v1688_v24, 0.0  ;;  %v1692_v47 = vmul.f32 %v3365_v25, %v3429_v56 }
 0x452   : > { %v1451_v41 = vmul.f32 %v3167_v60, %v3313_v53  ;;  %v3579_v63 = vsel %vm1366_vm8, %v1691_v54, 0.0  ;;  %v3582_v45 = vsel %vm1366_vm8, %v1690_v52, 0.0  ;;  %v3585_v27 = vsel %vm1366_vm8, %v1693_v61, 0.0  ;;  %v4012_v53 = vld [vmem:[#allocation3_spill] sm:$0xff] }
 0x453   : > { %1474 = vadd.xlane.f32.xlu1 %v1473_v51  ;;  %v3588_v46 = vsel %vm1366_vm8, %v1692_v47, 0.0  ;;  %v1479_v29 = vsel %vm1366_vm8, %v1452_v37, 0.0  ;;  %v1454_v25 = vmul.f32 %v3181_v4, %v3384_v43  ;;  %v1443_v60 = vadd.f32 0.5, %v3186_v7  ;;  %v4016_v43 = vld [vmem:[#allocation7_spill] sm:$0xff]  ;;  %v4017_v51 = vld [vmem:[#allocation4_spill] sm:$0xff] }
 0x454   : > { %1471 = vadd.xlane.f32.xlu0 %v1470_v55  ;;  %v1537_v0 = vmul.f32 0.5, %v4012_v53  ;;  %v1476_v2 = vsel %vm1366_vm8, %v1451_v41, 0.0  ;;  %v1453_v23 = vmul.f32 %v4013_v20, %v3347_v32  ;;  %v1442_v55 = vadd.f32 0.5, %v4014_v30  ;;  %v2410_v20 = vld [vmem:[%s2625_s11] sm:$0xff] }
 0x455   : > { %v1431_v36 = vmul.f32 0.5, %v4015_v44  ;;  %v1485_v39 = vsel %vm1366_vm8, %v1454_v25, 0.0  ;;  %v1456_v24 = vmul.f32 %v1443_v60, %v3429_v56  ;;  %v1539_v7 = vmul.f32 0.5, %v4016_v43 }
 0x456   : > { %v1550_v4 = vadd.f32 0.5, %v1537_v0  ;;  %v1482_v54 = vsel %vm1366_vm8, %v1453_v23, 0.0  ;;  %v1455_v52 = vmul.f32 %v1442_v55, %v3394_v35  ;;  %v1538_v32 = vmul.f32 0.5, %v4017_v51 }
 0x457   : > { %1480 = vadd.xlane.f32.xlu1 %v1479_v29  ;;  %v1444_v61 = vadd.f32 0.5, %v1431_v36  ;;  %v1491_v37 = vsel %vm1366_vm8, %v1456_v24, 0.0  ;;  %v1552_v41 = vadd.f32 0.5, %v1539_v7  ;;  %v1772_v23 = vmul.f32 %v2410_v20, %v3231_v19 }
 0x458   : > { %1477 = vadd.xlane.f32.xlu0 %v1476_v2  ;;  %v1563_v47 = vmul.f32 %v1550_v4, %v3231_v19  ;;  %v1488_v56 = vsel %vm1366_vm8, %v1455_v52, 0.0  ;;  %v1551_v25 = vadd.f32 0.5, %v1538_v32  ;;  %v4018_v19 = vld [vmem:[#allocation9_spill] sm:$0xff] }
 0x459   : > { %v1457_v29 = vmul.f32 %v1444_v61, %v3440_v8  ;;  %v1565_v60 = vmul.f32 %v1552_v41, %v3258_v10  ;;  %v2411_v8 = vld [vmem:[%s2625_s11 + $0x8] sm:$0xff]  ;;  %v1785_v10 = vsel %vm1366_vm8, %v1772_v23, 0.0 }
 0x45a   : > { %v1576_v35 = vsel %vm1366_vm8, %v1563_v47, 0.0  ;;  %v1564_v0 = vmul.f32 %v1551_v25, %v3252_v42  ;;  %v1773_v55 = vmul.f32 %v2411_v8, %v3252_v42 }
 0x45b   : > { %1486 = vadd.xlane.f32.xlu1 %v1485_v39  ;;  %v1494_v53 = vsel %vm1366_vm8, %v1457_v29, 0.0  ;;  %v1582_v2 = vsel %vm1366_vm8, %v1565_v60, 0.0 }
 0x45c   : > { %1483 = vadd.xlane.f32.xlu0 %v1482_v54  ;;  %v1579_v30 = vsel %vm1366_vm8, %v1564_v0, 0.0  ;;  %v1788_v44 = vsel %vm1366_vm8, %v1773_v55, 0.0  ;;  %vm1968_vm8 = vcmask 39936  }
 0x45f   : > { %1492 = vadd.xlane.f32.xlu1 %v1491_v37 }
 0x460   : > { %1489 = vadd.xlane.f32.xlu0 %v1488_v56 }
 0x463   : > { %1577 = vadd.xlane.f32.xlu1 %v1576_v35 }
 0x464   : > { %1495 = vadd.xlane.f32.xlu0 %v1494_v53 }
 0x467   : > { %1583 = vadd.xlane.f32.xlu1 %v1582_v2 }
 0x468   : > { %1580 = vadd.xlane.f32.xlu0 %v1579_v30 }
 0x46b   : > { %1786 = vadd.xlane.f32.xlu1 %v1785_v10 }
 0x46c   : > { %1789 = vadd.xlane.f32.xlu0 %v1788_v44 }
 0x46f   : > { %1792 = vadd.xlane.f32.xlu1 %v3373_v13 }
 0x470   : > { %1795 = vadd.xlane.f32.xlu0 %v3361_v49 }
 0x473   : > { %1798 = vadd.xlane.f32.xlu1 %v3388_v62 }
 0x474   : > { %1801 = vadd.xlane.f32.xlu0 %v3376_v14 }
 0x477   : > { %1804 = vadd.xlane.f32.xlu1 %v3422_v31 }
 0x478   : > { %1807 = vadd.xlane.f32.xlu0 %v4018_v19 }
 0x47b   : > { %1810 = vadd.xlane.f32.xlu1 %v3425_v15 }
 0x47c   : > { %1813 = vadd.xlane.f32.xlu0 %v3434_v11 }
 0x47f   : > { %1816 = vadd.xlane.f32.xlu1 %v3456_v1 }
 0x480   : > { %1819 = vadd.xlane.f32.xlu0 %v3471_v40 }
 0x483   : > { %1822 = vadd.xlane.f32.xlu1 %v3481_v3 }
 0x484   : > { %1586 = vadd.xlane.f32.xlu0 %v3465_v21 }
 0x487   : > { %1589 = vadd.xlane.f32.xlu1 %v3488_v9 }
 0x488   : > { %1592 = vadd.xlane.f32.xlu0 %v3474_v57 }
 0x48b   : > { %1595 = vadd.xlane.f32.xlu1 %v3500_v12 }
 0x48c   : > { %1598 = vadd.xlane.f32.xlu0 %v3497_v50 }
 0x48f   : > { %1601 = vadd.xlane.f32.xlu1 %v3512_v28 }
 0x490   : > { %1604 = vadd.xlane.f32.xlu0 %v3509_v22 }
 0x493   : > { %1607 = vadd.xlane.f32.xlu1 %v3520_v26 }
 0x494   : > { %1610 = vadd.xlane.f32.xlu0 %v3515_v18 }
 0x497   : > { %1613 = vadd.xlane.f32.xlu1 %v3529_v58 }
 0x498   : > { %1695 = vadd.xlane.f32.xlu0 %v3506_v16 }
 0x49b   : > { %1698 = vadd.xlane.f32.xlu1 %v3541_v34 }
 0x49c   : > { %1701 = vadd.xlane.f32.xlu0 %v3538_v59 }
 0x49f   : > { %1704 = vadd.xlane.f32.xlu1 %v3549_v33 }
 0x4a0   : > { %1707 = vadd.xlane.f32.xlu0 %v3544_v17 }
 0x4a3   : > { %1710 = vadd.xlane.f32.xlu1 %v3555_v6 }
 0x4a4   : > { %1713 = vadd.xlane.f32.xlu0 %v3552_v48 }
 0x4a7   : > { %1716 = vadd.xlane.f32.xlu1 %v3572_v5 }
 0x4a8   : > { %1719 = vadd.xlane.f32.xlu0 %v3560_v38 }
 0x4ab   : > { %1722 = vadd.xlane.f32.xlu1 %v3582_v45 }
 0x4ac   : > { %1725 = vadd.xlane.f32.xlu0 %v3579_v63 }
 0x4af   : > { %1728 = vadd.xlane.f32.xlu1 %v3588_v46 }
 0x4b0   : > { %1731 = vadd.xlane.f32.xlu0 %v3585_v27 }
 0x4b8   : > { %v3656_v42 = vpop.xlane.xlu0 %1734 }
 0x4b9   : > { %2347 = vrcp.f32 %v3656_v42  ;;  %vm1824_vm9 = vcmp.le.f32.partialorder %v3656_v42, 1e-10 }
 0x4bc   : > { %v3658_v49 = vpop.xlane.xlu1 %1737 }
 0x4bd   : > { %2349 = vrcp.f32 %v3658_v49  ;;  %vm1825_vm10 = vcmp.le.f32.partialorder %v3658_v49, 1e-10 }
 0x4be   : > { %v3660_v13 = vpop.xlane.xlu0 %1740 }
 0x4bf   : > { %2351 = vrcp.f32 %v3660_v13  ;;  %vm1826_vm11 = vcmp.le.f32.partialorder %v3660_v13, 1e-10 }
 0x4c1   : > { %v3662_v14 = vpop.xlane.xlu1 %1743 }
 0x4c2   : > { %v3664_v62 = vpop.xlane.xlu0 %1746  ;;  %2353 = vrcp.f32 %v3662_v14  ;;  %vm1827_vm12 = vcmp.le.f32.partialorder %v3662_v14, 1e-10 }
 0x4c3   : > { %2355 = vrcp.f32 %v3664_v62  ;;  %v2348_v37 = vpop.eup %2347  ;;  %vm1828_vm13 = vcmp.le.f32.partialorder %v3664_v62, 1e-10 }
 0x4c7   : > { %v3666_v31 = vpop.xlane.xlu1 %1749  ;;  %v2350_v25 = vpop.eup %2349 }
 0x4c8   : > { %v3668_v15 = vpop.xlane.xlu0 %1752  ;;  %2357 = vrcp.f32 %v3666_v31  ;;  %vm1829_vm14 = vcmp.le.f32.partialorder %v3666_v31, 1e-10 }
 0x4c9   : > { %2359 = vrcp.f32 %v3668_v15  ;;  %v2352_v60 = vpop.eup %2351  ;;  %vm1830_vm15 = vcmp.le.f32.partialorder %v3668_v15, 1e-10 }
 0x4cb   : > { %v3670_v11 = vpop.xlane.xlu1 %1755 }
 0x4cc   : > { %v3672_v1 = vpop.xlane.xlu0 %1758  ;;  %2361 = vrcp.f32 %v3670_v11  ;;  %v2354_v8 = vpop.eup %2353  ;;  %vm1831_vm0 = vcmp.le.f32.partialorder %v3670_v11, 1e-10 }
 0x4cd   : > { %2363 = vrcp.f32 %v3672_v1  ;;  %vm1832_vm1 = vcmp.le.f32.partialorder %v3672_v1, 1e-10  ;;  %v2356_v44 = vpop.eup %2355 }
 0x4cf   : > { %v3674_v21 = vpop.xlane.xlu1 %1761 }
 0x4d0   : > { %2365 = vrcp.f32 %v3674_v21  ;;  %vm1833_vm7 = vcmp.le.f32.partialorder %v3674_v21, 1e-10 }
 0x4d1   : > { %v3676_v40 = vpop.xlane.xlu0 %1764 }
 0x4d2   : > { %2367 = vrcp.f32 %v3676_v40 }
 0x4d4   : > { %v3678_v57 = vpop.xlane.xlu1 %1767 }
 0x4d5   : > { %v3680_v3 = vpop.xlane.xlu0 %1770 }
 0x4d8   : > { %v3682_v9 = vpop.xlane.xlu1 %1459 }
 0x4d9   : > { %v3684_v50 = vpop.xlane.xlu0 %1462 }
 0x4dc   : > { %v3686_v12 = vpop.xlane.xlu1 %1468 }
 0x4dd   : > { %v3688_v16 = vpop.xlane.xlu0 %1465 }
 0x4e0   : > { %v3690_v22 = vpop.xlane.xlu1 %1474 }
 0x4e1   : > { %v3692_v28 = vpop.xlane.xlu0 %1471 }
 0x4e4   : > { %v3694_v18 = vpop.xlane.xlu1 %1480 }
 0x4e5   : > { %v3696_v26 = vpop.xlane.xlu0 %1477 }
 0x4e8   : > { %v3698_v58 = vpop.xlane.xlu1 %1486 }
 0x4e9   : > { %v3700_v59 = vpop.xlane.xlu0 %1483 }
 0x4ec   : > { %v3702_v34 = vpop.xlane.xlu1 %1492 }
 0x4ed   : > { %4019 = vst [vmem:[#allocation3_spill] sm:$0xff] %v3702_v34  ;;  %v3704_v17 = vpop.xlane.xlu0 %1489 }
 0x4f0   : > { %v3706_v33 = vpop.xlane.xlu1 %1577 }
 0x4f1   : > { %v3708_v48 = vpop.xlane.xlu0 %1495 }
 0x4f2   : > { %4020 = vst [vmem:[#allocation5_spill] sm:$0xff] %v3708_v48 }
 0x4f4   : > { %v3710_v6 = vpop.xlane.xlu1 %1583 }
 0x4f5   : > { %v3712_v38 = vpop.xlane.xlu0 %1580 }
 0x4f8   : > { %v1787_v5 = vpop.xlane.xlu1 %1786 }
 0x4f9   : > { %v1790_v63 = vpop.xlane.xlu0 %1789  ;;  %v3730_v51 = vsel %vm1824_vm9, 1e+10, %v1787_v5  ;;  %vm1982_vm9 = vcmask 48128  }
 0x4fa   : > { %v3740_v41 = vsel %vm1825_vm10, 1e+10, %v1790_v63  ;;  %v1851_v56 = vmul.f32 %v2348_v37, %v3730_v51  ;;  %vm1835_vm10 = vcmp.le.f32.partialorder %v3678_v57, 1e-10 }
 0x4fb   : > { %v1853_v53 = vmul.f32 %v2350_v25, %v3740_v41 }
 0x4fc   : > { %v1793_v45 = vpop.xlane.xlu1 %1792  ;;  %v1876_v2 = vmax.f32 %v1851_v56, 1e-10 }
 0x4fd   : > { %v1796_v27 = vpop.xlane.xlu0 %1795  ;;  %v3745_v29 = vsel %vm1826_vm11, 1e+10, %v1793_v45  ;;  %v1877_v19 = vmax.f32 %v1853_v53, 1e-10  ;;  %vm1834_vm11 = vcmp.le.f32.partialorder %v3676_v40, 1e-10 }
 0x4fe   : > { %v3755_v20 = vsel %vm1827_vm12, 1e+10, %v1796_v27  ;;  %v1855_v23 = vmul.f32 %v2352_v60, %v3745_v29  ;;  %v2358_v27 = vpop.eup %2357  ;;  %2369 = vrcp.f32 %v1876_v2  ;;  %vm1836_vm12 = vcmp.le.f32.partialorder %v3680_v3, 1e-10 }
 0x4ff   : > { %v1857_v5 = vmul.f32 %v2354_v8, %v3755_v20  ;;  %v2360_v56 = vpop.eup %2359  ;;  %2371 = vrcp.f32 %v3678_v57 }
 0x500   : > { %v1799_v46 = vpop.xlane.xlu1 %1798  ;;  %v2362_v48 = vpop.eup %2361  ;;  %2373 = vrcp.f32 %v1877_v19 }
 0x501   : > { %v1802_v36 = vpop.xlane.xlu0 %1801  ;;  %v3759_v30 = vsel %vm1828_vm13, 1e+10, %v1799_v46  ;;  %v1878_v46 = vmax.f32 %v1855_v23, 1e-10  ;;  %v2364_v8 = vpop.eup %2363  ;;  %v1879_v2 = vmax.f32 %v1857_v5, 1e-10 }
 0x502   : > { %v3762_v55 = vsel %vm1829_vm14, 1e+10, %v1802_v36  ;;  %v1859_v36 = vmul.f32 %v2356_v44, %v3759_v30  ;;  %v2366_v19 = vpop.eup %2365 }
 0x503   : > { %v1861_v25 = vmul.f32 %v2358_v27, %v3762_v55  ;;  %2375 = vrcp.f32 %v1878_v46 }
 0x504   : > { %v1805_v39 = vpop.xlane.xlu1 %1804  ;;  %2377 = vrcp.f32 %v3680_v3 }
 0x505   : > { %v1808_v24 = vpop.xlane.xlu0 %1807  ;;  %v3770_v63 = vsel %vm1830_vm15, 1e+10, %v1805_v39  ;;  %2379 = vrcp.f32 %v1879_v2  ;;  %v1917_v2 = vsel %vm840_vm2, %v3688_v16, %v3710_v6 }
 0x506   : > { %v3775_v37 = vsel %vm1831_vm0, 1e+10, %v1808_v24  ;;  %v1863_v39 = vmul.f32 %v2360_v56, %v3770_v63  ;;  %v1881_v56 = vmax.f32 %v1861_v25, 1e-10 }
 0x507   : > { %v1865_v23 = vmul.f32 %v2362_v48, %v3775_v37  ;;  %v1915_v48 = vsel %vm840_vm2, %v3682_v9, %v3706_v33  ;;  %v2368_v33 = vpop.eup %2367 }
 0x508   : > { %v1811_v4 = vpop.xlane.xlu1 %1810  ;;  %v1882_v5 = vmax.f32 %v1863_v39, 1e-10  ;;  %v1916_v39 = vsel %vm840_vm2, %v3684_v50, %v3712_v38 }
 0x509   : > { %v3714_v43 = vpop.xlane.xlu0 %1813  ;;  %v3778_v60 = vsel %vm1832_vm1, 1e+10, %v1811_v4  ;;  %v1880_v4 = vmax.f32 %v1859_v36, 1e-10 }
 0x50a   : > { %v3789_v44 = vsel %vm1833_vm7, 1e+10, %v3714_v43  ;;  %v1867_v27 = vmul.f32 %v2364_v8, %v3778_v60  ;;  %v1883_v43 = vmax.f32 %v1865_v23, 1e-10  ;;  %v2370_v23 = vpop.eup %2369 }
 0x50b   : > { %v1869_v36 = vmul.f32 %v2366_v19, %v3789_v44  ;;  %2381 = vrcp.f32 %v1880_v4  ;;  %v2372_v19 = vpop.eup %2371 }
 0x50c   : > { %v3717_v7 = vpop.xlane.xlu1 %1816  ;;  %v1884_v34 = vmax.f32 %v1867_v27, 1e-10  ;;  %2383 = vrcp.f32 %v1881_v56 }
 0x50d   : > { %v3719_v54 = vpop.xlane.xlu0 %1819  ;;  %v3802_v25 = vsel %vm1834_vm11, 1e+10, %v3717_v7  ;;  %2385 = vrcp.f32 %v1882_v5 }
 0x50e   : > { %v3823_v4 = vsel %vm1835_vm10, 1e+10, %v3719_v54  ;;  %v1871_v50 = vmul.f32 %v2368_v33, %v3802_v25  ;;  %2387 = vrcp.f32 %v1883_v43 }
 0x50f   : > { %2389 = vrcp.f32 %v1884_v34 }
 0x510   : > { %v3723_v52 = vpop.xlane.xlu1 %1822  ;;  %v1886_v33 = vmax.f32 %v1871_v50, 1e-10 }
 0x511   : > { %v3725_v61 = vpop.xlane.xlu0 %1586  ;;  %v3838_v43 = vsel %vm1836_vm12, 1e+10, %v3723_v52 }
 0x514   : > { %v3733_v32 = vpop.xlane.xlu1 %1589 }
 0x515   : > { %v3737_v47 = vpop.xlane.xlu0 %1592 }
 0x518   : > { %v3747_v35 = vpop.xlane.xlu1 %1595 }
 0x519   : > { %v3752_v0 = vpop.xlane.xlu0 %1598 }
 0x51c   : > { %v3766_v10 = vpop.xlane.xlu1 %1601 }
 0x51d   : > { %v3772_v45 = vpop.xlane.xlu0 %1604 }
 0x520   : > { %v3782_v53 = vpop.xlane.xlu1 %1607 }
 0x521   : > { %v3786_v24 = vpop.xlane.xlu0 %1610 }
 0x524   : > { %v3798_v46 = vpop.xlane.xlu1 %1613 }
 0x525   : > { %v1696_v8 = vpop.xlane.xlu0 %1695 }
 0x526   : > { %v1928_v9 = vsel %vm984_vm3, %v1915_v48, %v1696_v8  ;;  %v2374_v8 = vpop.eup %2373 }
 0x527   : > { %v1942_v7 = vsel %vm1941_vm6, %v1928_v9, %v3656_v42  ;;  %v1885_v42 = vmax.f32 %v1869_v36, 1e-10  ;;  %v2376_v9 = vpop.eup %2375 }
 0x528   : > { %v1955_v16 = vsel %vm1063_vm4, %v1942_v7, %v3730_v51  ;;  %v1699_v6 = vpop.xlane.xlu1 %1698  ;;  %v1873_v51 = vmul.f32 %v2372_v19, %v3823_v4  ;;  %v2378_v7 = vpop.eup %2377  ;;  %v1920_v19 = vsel %vm840_vm2, %v3690_v22, %v3737_v47 }
 0x529   : > { %v1969_v38 = vsel %vm1968_vm8, %v1955_v16, %v2370_v23  ;;  %v1702_v27 = vpop.xlane.xlu0 %1701  ;;  %v1929_v56 = vsel %vm984_vm3, %v1916_v39, %v1699_v6  ;;  %2391 = vrcp.f32 %v1885_v42 }
 0x52a   : > { %v1983_v48 = vsel %vm1982_vm9, %v1969_v38, 0.0  ;;  %v1930_v54 = vsel %vm984_vm3, %v1917_v2, %v1702_v27  ;;  %v1943_v5 = vsel %vm1941_vm6, %v1929_v56, %v3658_v49  ;;  %v1918_v49 = vsel %vm840_vm2, %v3686_v12, %v3725_v61  ;;  %v2380_v38 = vpop.eup %2379 }
 0x52b   : > { %1996 = vst.msk [vmem:[%s3818_s30] sm:$0xff] %vm1142_vm5, %v1983_v48  ;;  %v1944_v34 = vsel %vm1941_vm6, %v1930_v54, %v3660_v13  ;;  %v1956_v36 = vsel %vm1063_vm4, %v1943_v5, %v3740_v41  ;;  %v1919_v13 = vsel %vm840_vm2, %v3692_v28, %v3733_v32  ;;  %v1875_v12 = vmul.f32 %v2378_v7, %v3838_v43  ;;  %v2382_v56 = vpop.eup %2381 }
 0x52c   : > { %v1957_v39 = vsel %vm1063_vm4, %v1944_v34, %v3745_v29  ;;  %v1970_v52 = vsel %vm1968_vm8, %v1956_v36, %v2374_v8  ;;  %v1705_v2 = vpop.xlane.xlu1 %1704  ;;  %v1887_v28 = vmax.f32 %v1873_v51, 1e-10  ;;  %2393 = vrcp.f32 %v1886_v33  ;;  %v2384_v54 = vpop.eup %2383 }
 0x52d   : > { %v1971_v41 = vsel %vm1968_vm8, %v1957_v39, %v2376_v9  ;;  %v1984_v23 = vsel %vm1982_vm9, %v1970_v52, 0.0  ;;  %v1708_v50 = vpop.xlane.xlu0 %1707  ;;  %v1931_v16 = vsel %vm984_vm3, %v1918_v49, %v1705_v2  ;;  %v2386_v22 = vpop.eup %2385  ;;  %v1888_v47 = vmax.f32 %v1875_v12, 1e-10 }
 0x52e   : > { %v1985_v61 = vsel %vm1982_vm9, %v1971_v41, 0.0  ;;  %1997 = vst.msk [vmem:[%s3818_s30 + $0x8] sm:$0xff] %vm1142_vm5, %v1984_v23  ;;  %v1932_v29 = vsel %vm984_vm3, %v1919_v13, %v1708_v50  ;;  %v1945_v6 = vsel %vm1941_vm6, %v1931_v16, %v3662_v14  ;;  %v2388_v9 = vpop.eup %2387  ;;  %2395 = vrcp.f32 %v1887_v28 }
 0x52f   : > { %1998 = vst.msk [vmem:[%s3818_s30 + $0x10] sm:$0xff] %vm1142_vm5, %v1985_v61  ;;  %v1946_v32 = vsel %vm1941_vm6, %v1932_v29, %v3664_v62  ;;  %v1958_v27 = vsel %vm1063_vm4, %v1945_v6, %v3755_v20  ;;  %v1921_v62 = vsel %vm840_vm2, %v3696_v26, %v3747_v35  ;;  %v2390_v33 = vpop.eup %2389  ;;  %v1922_v49 = vsel %vm840_vm2, %v3694_v18, %v3752_v0 }
 0x530   : > { %v1959_v14 = vsel %vm1063_vm4, %v1946_v32, %v3759_v30  ;;  %v1972_v42 = vsel %vm1968_vm8, %v1958_v27, %v2380_v38  ;;  %v1711_v48 = vpop.xlane.xlu1 %1710  ;;  %2397 = vrcp.f32 %v1888_v47  ;;  %v1924_v41 = vsel %vm840_vm2, %v3698_v58, %v3772_v45  ;;  %v4021_v38 = vld [vmem:[#allocation3_spill] sm:$0xff] }
 0x531   : > { %v1973_v20 = vsel %vm1968_vm8, %v1959_v14, %v2382_v56  ;;  %v1986_v5 = vsel %vm1982_vm9, %v1972_v42, 0.0  ;;  %v1714_v8 = vpop.xlane.xlu0 %1713  ;;  %v1933_v51 = vsel %vm984_vm3, %v1920_v19, %v1711_v48  ;;  %v1925_v12 = vsel %vm840_vm2, %v3704_v17, %v3782_v53 }
 0x532   : > { %v1987_v30 = vsel %vm1982_vm9, %v1973_v20, 0.0  ;;  %1999 = vst.msk [vmem:[%s3818_s30 + $0x18] sm:$0xff] %vm1142_vm5, %v1986_v5  ;;  %v1934_v34 = vsel %vm984_vm3, %v1921_v62, %v1714_v8  ;;  %v1947_v36 = vsel %vm1941_vm6, %v1933_v51, %v3666_v31  ;;  %v1926_v28 = vsel %vm840_vm2, %v4021_v38, %v3786_v24 }
 0x533   : > { %2000 = vst.msk [vmem:[%s3818_s30 + $0x20] sm:$0xff] %vm1142_vm5, %v1987_v30  ;;  %v1948_v26 = vsel %vm1941_vm6, %v1934_v34, %v3668_v15  ;;  %v1960_v35 = vsel %vm1063_vm4, %v1947_v36, %v3762_v55  ;;  %v1923_v15 = vsel %vm840_vm2, %v3700_v59, %v3766_v10  ;;  %v2392_v16 = vpop.eup %2391 }
 0x534   : > { %v1961_v31 = vsel %vm1063_vm4, %v1948_v26, %v3770_v63  ;;  %v1974_v39 = vsel %vm1968_vm8, %v1960_v35, %v2384_v54  ;;  %v1717_v52 = vpop.xlane.xlu1 %1716 }
 0x535   : > { %v1975_v2 = vsel %vm1968_vm8, %v1961_v31, %v2386_v22  ;;  %v1988_v55 = vsel %vm1982_vm9, %v1974_v39, 0.0  ;;  %v1720_v7 = vpop.xlane.xlu0 %1719  ;;  %v1935_v13 = vsel %vm984_vm3, %v1922_v49, %v1717_v52 }
 0x536   : > { %v1989_v18 = vsel %vm1982_vm9, %v1975_v2, 0.0  ;;  %2001 = vst.msk [vmem:[%s3818_s30 + $0x28] sm:$0xff] %vm1142_vm5, %v1988_v55  ;;  %v1936_v0 = vsel %vm984_vm3, %v1923_v15, %v1720_v7  ;;  %v1949_v63 = vsel %vm1941_vm6, %v1935_v13, %v3670_v11  ;;  %v2394_v6 = vpop.eup %2393 }
 0x537   : > { %2002 = vst.msk [vmem:[%s3818_s30 + $0x30] sm:$0xff] %vm1142_vm5, %v1989_v18  ;;  %v1950_v59 = vsel %vm1941_vm6, %v1936_v0, %v3672_v1  ;;  %v1962_v10 = vsel %vm1063_vm4, %v1949_v63, %v3775_v37 }
 0x538   : > { %v1963_v23 = vsel %vm1063_vm4, %v1950_v59, %v3778_v60  ;;  %v1976_v50 = vsel %vm1968_vm8, %v1962_v10, %v2388_v9  ;;  %v1723_v11 = vpop.xlane.xlu1 %1722  ;;  %v2396_v24 = vpop.eup %2395 }
 0x539   : > { %v1977_v1 = vsel %vm1968_vm8, %v1963_v23, %v2390_v33  ;;  %v1990_v37 = vsel %vm1982_vm9, %v1976_v50, 0.0  ;;  %v1726_v61 = vpop.xlane.xlu0 %1725  ;;  %v1937_v29 = vsel %vm984_vm3, %v1924_v41, %v1723_v11 }
 0x53a   : > { %v1991_v58 = vsel %vm1982_vm9, %v1977_v1, 0.0  ;;  %2003 = vst.msk [vmem:[%s3818_s30 + $0x38] sm:$0xff] %vm1142_vm5, %v1990_v37  ;;  %v1938_v45 = vsel %vm984_vm3, %v1925_v12, %v1726_v61  ;;  %v1951_v60 = vsel %vm1941_vm6, %v1937_v29, %v3674_v21  ;;  %v4022_v21 = vld [vmem:[#allocation5_spill] sm:$0xff]  ;;  %v2398_v20 = vpop.eup %2397 }
 0x53b   : > { %2004 = vst.msk [vmem:[%s3818_s30 + $0x40] sm:$0xff] %vm1142_vm5, %v1991_v58  ;;  %v1952_v17 = vsel %vm1941_vm6, %v1938_v45, %v3676_v40  ;;  %v1964_v53 = vsel %vm1063_vm4, %v1951_v60, %v3789_v44  ;;  %v1927_v19 = vsel %vm840_vm2, %v4022_v21, %v3798_v46 }
 0x53c   : > { %v1965_v32 = vsel %vm1063_vm4, %v1952_v17, %v3802_v25  ;;  %v1978_v27 = vsel %vm1968_vm8, %v1964_v53, %v2392_v16  ;;  %v1729_v56 = vpop.xlane.xlu1 %1728 }
 0x53d   : > { %v1979_v40 = vsel %vm1968_vm8, %v1965_v32, %v2394_v6  ;;  %v1992_v14 = vsel %vm1982_vm9, %v1978_v27, 0.0  ;;  %v1732_v42 = vpop.xlane.xlu0 %1731  ;;  %v1939_v44 = vsel %vm984_vm3, %v1926_v28, %v1729_v56 }
 0x53e   : > { %v1993_v48 = vsel %vm1982_vm9, %v1979_v40, 0.0  ;;  %2005 = vst.msk [vmem:[%s3818_s30 + $0x48] sm:$0xff] %vm1142_vm5, %v1992_v14  ;;  %v1940_v25 = vsel %vm984_vm3, %v1927_v19, %v1732_v42  ;;  %v1953_v54 = vsel %vm1941_vm6, %v1939_v44, %v3678_v57 }
 0x53f   : > { %2006 = vst.msk [vmem:[%s3818_s30 + $0x50] sm:$0xff] %vm1142_vm5, %v1993_v48  ;;  %v1954_v46 = vsel %vm1941_vm6, %v1940_v25, %v3680_v3  ;;  %v1966_v62 = vsel %vm1063_vm4, %v1953_v54, %v3823_v4 }
 0x540   : > { %v1967_v5 = vsel %vm1063_vm4, %v1954_v46, %v3838_v43  ;;  %v1980_v8 = vsel %vm1968_vm8, %v1966_v62, %v2396_v24 }
 0x541   : > { %v1981_v51 = vsel %vm1968_vm8, %v1967_v5, %v2398_v20  ;;  %v1994_v22 = vsel %vm1982_vm9, %v1980_v8, 0.0 }
 0x542   : > { %v1995_v57 = vsel %vm1982_vm9, %v1981_v51, 0.0  ;;  %2007 = vst.msk [vmem:[%s3818_s30 + $0x58] sm:$0xff] %vm1142_vm5, %v1994_v22 }
 0x543   : > { %2008 = vst.msk [vmem:[%s3818_s30 + $0x60] sm:$0xff] %vm1142_vm5, %v1995_v57 }
 0x544 PF: > { %p12_p9 = scmp.ge.s32.totalorder %s2486_s19, 4   ;;  %s4023_s15 = smov %s2430_s16 }
 0x545   : > { %s4024_s16 = smov %s2495_s22  ;;  %s4025_s17 = smov %s2486_s19 }
 0x546   :  { %14 = sbr.rel (!%p12_p9) target bundleno = 2 (0x2), region = 126 }

</bundles_post_ra>
